<compile_context>
chip_gen: v7x
topology: tpu7x:2x2x1
jax: 0.10.0
libtpu: 0.0.40
codegen_flags: <defaults>
</compile_context>

<pallas_src>
import math

import jax
import jax.numpy as jnp
from jax.experimental import pallas as pl
from jax.experimental.pallas import tpu as pltpu


_SQRT_HALF = 0.7071067811865476  # 1/sqrt(2)


def _erf(z):
    """Elementwise erf, Abramowitz & Stegun 7.1.26 (max abs err ~1.5e-7)."""
    a1 = 0.254829592
    a2 = -0.284496736
    a3 = 1.421413741
    a4 = -1.453152027
    a5 = 1.061405429
    p = 0.3275911
    s = jnp.where(z < 0.0, -1.0, 1.0).astype(z.dtype)
    az = jnp.abs(z)
    # Exact divide kept on purpose (approx vrcp breaks the 1e-4 tolerance
    # after compounding through the polynomial); exp goes to the EUP slot.
    t = 1.0 / (1.0 + p * az)
    poly = ((((a5 * t + a4) * t + a3) * t + a2) * t + a1) * t
    return s * (1.0 - poly * jnp.exp(-az * az))


def _gelu(x):
    # Exact (erf-based) gelu, matching the PyTorch module's `gelu`.
    return x * 0.5 * (1.0 + _erf(x * _SQRT_HALF))


def _ffn_kernel(x_ref, w1_ref, b1_ref, w2_ref, b2_ref, o_ref, acc_ref):
    # x_ref: [TM, Dp], w1: [Dp, TK], b1: [1, TK], w2: [TK, Dp], b2: [1, Dp],
    # o_ref: [TM, Dp], acc_ref: [TM, Dp] f32 scratch.
    k = pl.program_id(1)

    @pl.when(k == 0)
    def _():
        acc_ref[...] = jnp.zeros_like(acc_ref)

    # ff1 chunk on the MXU, f32 accumulation (operands in weight dtype).
    x = x_ref[...].astype(w1_ref.dtype)
    h = jnp.dot(x, w1_ref[...], preferred_element_type=jnp.float32)
    h = h + b1_ref[...].astype(jnp.float32)
    h = _gelu(h)
    # Dropout: eval-mode identity.
    # TODO(synk): training-mode dropout (stochastic mask + 1/(1-p) scale).

    # ff2 partial product on the MXU; accumulate in f32 across k tiles.
    acc_ref[...] += jnp.dot(h.astype(w2_ref.dtype), w2_ref[...],
                            preferred_element_type=jnp.float32)

    @pl.when(k == pl.num_programs(1) - 1)
    def _():
        out = acc_ref[...] + b2_ref[...].astype(jnp.float32)
        o_ref[...] = out.astype(o_ref.dtype)


def _round_up(n, m):
    return ((n + m - 1) // m) * m


def positionwise_feed_forward(x, w1, b1, w2, b2, *, block_m=512, block_k=512):
    """x: [B, T, d_model]; w1: [d_model, d_ff]; w2: [d_ff, d_model]."""
    B, T, d_model = x.shape
    d_ff = w1.shape[1]
    assert w1.shape == (d_model, d_ff)
    assert b1.shape == (d_ff,)
    assert w2.shape == (d_ff, d_model)
    assert b2.shape == (d_model,)

    n = B * T
    xf = x.reshape(n, d_model)

    # ---- lane-dense padding of the model/ff dims (zeros -> exact results) ----
    d_model_p = _round_up(d_model, 128)
    tk = min(block_k, _round_up(d_ff, 128))       # d_ff tile (reduction axis)
    d_ff_p = _round_up(d_ff, tk)
    nk = d_ff_p // tk

    # ---- token tile: MXU-friendly multiples, padded rows sliced off later ----
    tm = min(block_m, _round_up(n, 8))
    if tm >= 256:
        tm = (tm // 256) * 256                    # MXU height on v6e/v7x
    elif tm >= 128:
        tm = 128                                  # MXU height on v5e
    # NOTE: for tiny n (e.g. n < 128) letting XLA run the two dots would beat
    # the per-call + weight-DMA overhead; we keep the Pallas path for parity.
    n_pad = _round_up(n, tm)

    if n_pad != n or d_model_p != d_model:
        xf = jnp.pad(xf, ((0, n_pad - n), (0, d_model_p - d_model)))
    w1p = w1
    if d_model_p != d_model or d_ff_p != d_ff:
        w1p = jnp.pad(w1, ((0, d_model_p - d_model), (0, d_ff_p - d_ff)))
    b1p = b1 if d_ff_p == d_ff else jnp.pad(b1, (0, d_ff_p - d_ff))
    w2p = w2
    if d_ff_p != d_ff or d_model_p != d_model:
        w2p = jnp.pad(w2, ((0, d_ff_p - d_ff), (0, d_model_p - d_model)))
    b2p = b2 if d_model_p == d_model else jnp.pad(b2, (0, d_model_p - d_model))
    b1p = b1p.reshape(1, d_ff_p)
    b2p = b2p.reshape(1, d_model_p)

    grid = (n_pad // tm, nk)
    weights_resident = (nk == 1)   # constant index maps -> single-buffer them

    def _spec(shape, index_map, single_buffer):
        if single_buffer:
            return pl.BlockSpec(shape, index_map, pipeline_mode=pl.Buffered(1))
        return pl.BlockSpec(shape, index_map)

    in_specs = [
        # x tile streams with the token axis (re-used across k steps).
        pl.BlockSpec((tm, d_model_p), lambda i, k: (i, 0)),
        # W1 / b1 / W2 tiled along d_ff; resident (single-buffered) when nk==1.
        _spec((d_model_p, tk), lambda i, k: (0, k), weights_resident),
        _spec((1, tk), lambda i, k: (0, k), weights_resident),
        _spec((tk, d_model_p), lambda i, k: (k, 0), weights_resident),
        # b2 is constant across the whole grid -> always single-buffered.
        _spec((1, d_model_p), lambda i, k: (0, 0), True),
    ]
    out_spec = pl.BlockSpec((tm, d_model_p), lambda i, k: (i, 0))

    grid_spec = pltpu.PrefetchScalarGridSpec(
        num_scalar_prefetch=0,
        grid=grid,
        in_specs=in_specs,
        out_specs=out_spec,
        scratch_shapes=[pltpu.VMEM((tm, d_model_p), jnp.float32)],
    )

    # ---- VMEM budget estimate; only raise the scoped limit when needed ----
    x_isz = xf.dtype.itemsize
    w_isz = w1p.dtype.itemsize
    w_bufs = 1 if weights_resident else 2
    vmem_est = (
        2 * tm * d_model_p * x_isz                     # x tile, double-buffered
        + 2 * tm * d_model_p * x_isz                   # out tile, double-buffered
        + tm * d_model_p * 4                           # f32 accumulator
        + w_bufs * (2 * d_model_p * tk + tk + d_model_p) * w_isz  # W1,W2,b1,b2
        + tm * tk * 4                                  # gelu chunk (registers/spill)
    )
    vmem_limit = None
    if vmem_est > 16 * 1024 * 1024:
        vmem_limit = min(int(vmem_est * 1.25) + (4 << 20), 96 << 20)

    cost = pl.CostEstimate(
        flops=4 * n_pad * d_model_p * d_ff_p,          # two matmuls
        transcendentals=n_pad * d_ff_p,                # one exp per gelu element
        bytes_accessed=(2 * n_pad * d_model_p * x_isz
                        + (w1p.size + w2p.size) * w_isz
                        + (b1p.size + b2p.size) * w_isz),
    )

    out = pl.pallas_call(
        _ffn_kernel,
        out_shape=jax.ShapeDtypeStruct((n_pad, d_model_p), x.dtype),
        grid_spec=grid_spec,
        compiler_params=pltpu.CompilerParams(
            # Token tiles independent -> shard across v7x's 2 TCs;
            # d_ff axis is a reduction into the scratch accumulator.
            dimension_semantics=("parallel", "arbitrary"),
            vmem_limit_bytes=vmem_limit,
        ),
        cost_estimate=cost,
    )(xf, w1p, b1p, w2p, b2p)

    return out[:n, :d_model].reshape(B, T, d_model)


def positionwise_feed_forward_ref(x, w1, b1, w2, b2):
    """Pure-JAX reference mirroring the PyTorch forward (eval mode)."""
    h = jnp.dot(x, w1) + b1
    h = h * 0.5 * (1.0 + jax.lax.erf(h * _SQRT_HALF))
    return jnp.dot(h, w2) + b2


if __name__ == "__main__":
    B, T, d_model, d_ff = 2, 8, 300, 512  # module defaults: d_model=300, d_ff=512

    key = jax.random.PRNGKey(0)
    kx, kw1, kb1, kw2, kb2 = jax.random.split(key, 5)
    x = jax.random.normal(kx, (B, T, d_model), dtype=jnp.float32)
    # nn.Linear-style init scale: U[-1/sqrt(fan_in), 1/sqrt(fan_in)].
    w1 = jax.random.uniform(kw1, (d_model, d_ff), jnp.float32,
                            -1.0 / math.sqrt(d_model), 1.0 / math.sqrt(d_model))
    b1 = jax.random.uniform(kb1, (d_ff,), jnp.float32,
                            -1.0 / math.sqrt(d_model), 1.0 / math.sqrt(d_model))
    w2 = jax.random.uniform(kw2, (d_ff, d_model), jnp.float32,
                            -1.0 / math.sqrt(d_ff), 1.0 / math.sqrt(d_ff))
    b2 = jax.random.uniform(kb2, (d_model,), jnp.float32,
                            -1.0 / math.sqrt(d_ff), 1.0 / math.sqrt(d_ff))

    out = positionwise_feed_forward(x, w1, b1, w2, b2)
    jax.block_until_ready(out)

    ref = positionwise_feed_forward_ref(x, w1, b1, w2, b2)
    assert out.shape == (B, T, d_model)
    max_err = float(jnp.max(jnp.abs(out - ref)))
    assert jnp.allclose(out, ref, atol=1e-4, rtol=1e-4), f"max abs err {max_err}"

    print("KERNEL_OK")
</pallas_src>

<mosaic_0001>
module attributes {stable_mosaic.version = 11 : i64} {
  func.func @_ffn_kernel(%arg0: i32, %arg1: i32, %arg2: memref<16x384xf32, #tpu.memory_space<vmem>>, %arg3: memref<384x512xf32, #tpu.memory_space<vmem>>, %arg4: memref<1x512xf32, #tpu.memory_space<vmem>>, %arg5: memref<512x384xf32, #tpu.memory_space<vmem>>, %arg6: memref<1x384xf32, #tpu.memory_space<vmem>>, %arg7: memref<16x384xf32, #tpu.memory_space<vmem>>, %arg8: memref<16x384xf32, #tpu.memory_space<vmem>>) attributes {dimension_semantics = [#tpu.dimension_semantics<parallel>, #tpu.dimension_semantics<arbitrary>], iteration_bounds = array<i64: 1, 1>, scalar_prefetch = 0 : i64, scratch_operands = 1 : i64, tpu.core_type = #tpu.core_type<tc>, window_params = [{transform_indices = @transform_0, window_bounds = array<i64: 16, 384>}, {pipeline_mode = #tpu.pipeline_mode<synchronous>, transform_indices = @transform_1, window_bounds = array<i64: 384, 512>}, {pipeline_mode = #tpu.pipeline_mode<synchronous>, transform_indices = @transform_2, window_bounds = array<i64: 1, 512>}, {pipeline_mode = #tpu.pipeline_mode<synchronous>, transform_indices = @transform_3, window_bounds = array<i64: 512, 384>}, {pipeline_mode = #tpu.pipeline_mode<synchronous>, transform_indices = @transform_4, window_bounds = array<i64: 1, 384>}, {transform_indices = @transform_5, window_bounds = array<i64: 16, 384>}]} {
    %c0_i32 = arith.constant 0 : i32
    %0 = arith.cmpi eq, %arg1, %c0_i32 : i32
    %1 = arith.extui %0 : i1 to i32
    %c0_i32_0 = arith.constant 0 : i32
    %2 = arith.cmpi ne, %1, %c0_i32_0 : i32
    scf.if %2 {
      %cst_31 = arith.constant 0.000000e+00 : f32
      %58 = vector.broadcast %cst_31 : f32 to vector<16x384xf32>
      %c0_32 = arith.constant 0 : index
      %c0_33 = arith.constant 0 : index
      %59 = vector.load %arg8[%c0_32, %c0_33] : memref<16x384xf32, #tpu.memory_space<vmem>>, vector<16x384xf32>
      tpu.vector_store %arg8[%c0_32, %c0_33], %58 {strides = array<i32>} : memref<16x384xf32, #tpu.memory_space<vmem>>, vector<16x384xf32>,
    } else {
    }
    %c0 = arith.constant 0 : index
    %c0_1 = arith.constant 0 : index
    %3 = vector.load %arg2[%c0, %c0_1] : memref<16x384xf32, #tpu.memory_space<vmem>>, vector<16x384xf32>
    %c0_2 = arith.constant 0 : index
    %c0_3 = arith.constant 0 : index
    %4 = vector.load %arg3[%c0_2, %c0_3] : memref<384x512xf32, #tpu.memory_space<vmem>>, vector<384x512xf32>
    %cst = arith.constant dense<0.000000e+00> : vector<16x512xf32>
    %5 = tpu.matmul %3, %4, %cst {dimension_numbers = #tpu.dot_dimension_numbers<[1], [0], [0], [1], [0, 0, 1, 1], [], []>} : vector<16x384xf32>, vector<384x512xf32>, vector<16x512xf32> -> vector<16x512xf32>
    %c0_4 = arith.constant 0 : index
    %c0_5 = arith.constant 0 : index
    %6 = vector.load %arg4[%c0_4, %c0_5] : memref<1x512xf32, #tpu.memory_space<vmem>>, vector<1x512xf32>
    %7 = vector.broadcast %6 : vector<1x512xf32> to vector<16x512xf32>
    %8 = arith.addf %5, %7 : vector<16x512xf32>
    %cst_6 = arith.constant 5.000000e-01 : f32
    %9 = vector.broadcast %cst_6 : f32 to vector<16x512xf32>
    %10 = arith.mulf %8, %9 : vector<16x512xf32>
    %cst_7 = arith.constant 0.707106769 : f32
    %11 = vector.broadcast %cst_7 : f32 to vector<16x512xf32>
    %12 = arith.mulf %8, %11 : vector<16x512xf32>
    %cst_8 = arith.constant 0.000000e+00 : f32
    %13 = vector.broadcast %cst_8 : f32 to vector<16x512xf32>
    %14 = arith.cmpf olt, %12, %13 : vector<16x512xf32>
    %cst_9 = arith.constant -1.000000e+00 : f32
    %cst_10 = arith.constant 1.000000e+00 : f32
    %15 = vector.broadcast %cst_9 : f32 to vector<16x512xf32>
    %16 = vector.broadcast %cst_10 : f32 to vector<16x512xf32>
    %17 = arith.select %14, %15, %16 : vector<16x512xi1>, vector<16x512xf32>
    %18 = math.absf %12 : vector<16x512xf32>
    %cst_11 = arith.constant 0.327591091 : f32
    %19 = vector.broadcast %cst_11 : f32 to vector<16x512xf32>
    %20 = arith.mulf %19, %18 : vector<16x512xf32>
    %cst_12 = arith.constant 1.000000e+00 : f32
    %21 = vector.broadcast %cst_12 : f32 to vector<16x512xf32>
    %22 = arith.addf %21, %20 : vector<16x512xf32>
    %cst_13 = arith.constant 1.000000e+00 : f32
    %23 = vector.broadcast %cst_13 : f32 to vector<16x512xf32>
    %24 = arith.divf %23, %22 : vector<16x512xf32>
    %cst_14 = arith.constant 1.06140542 : f32
    %25 = vector.broadcast %cst_14 : f32 to vector<16x512xf32>
    %26 = arith.mulf %25, %24 : vector<16x512xf32>
    %cst_15 = arith.constant -1.45315206 : f32
    %27 = vector.broadcast %cst_15 : f32 to vector<16x512xf32>
    %28 = arith.addf %26, %27 : vector<16x512xf32>
    %29 = arith.mulf %28, %24 : vector<16x512xf32>
    %cst_16 = arith.constant 1.42141378 : f32
    %30 = vector.broadcast %cst_16 : f32 to vector<16x512xf32>
    %31 = arith.addf %29, %30 : vector<16x512xf32>
    %32 = arith.mulf %31, %24 : vector<16x512xf32>
    %cst_17 = arith.constant -0.284496725 : f32
    %33 = vector.broadcast %cst_17 : f32 to vector<16x512xf32>
    %34 = arith.addf %32, %33 : vector<16x512xf32>
    %35 = arith.mulf %34, %24 : vector<16x512xf32>
    %cst_18 = arith.constant 0.254829586 : f32
    %36 = vector.broadcast %cst_18 : f32 to vector<16x512xf32>
    %37 = arith.addf %35, %36 : vector<16x512xf32>
    %38 = arith.mulf %37, %24 : vector<16x512xf32>
    %cst_19 = arith.constant 0.000000e+00 : f32
    %39 = vector.broadcast %cst_19 : f32 to vector<16x512xf32>
    %40 = arith.subf %39, %18 : vector<16x512xf32>
    %41 = arith.mulf %40, %18 : vector<16x512xf32>
    %42 = math.exp %41 : vector<16x512xf32>
    %43 = arith.mulf %38, %42 : vector<16x512xf32>
    %cst_20 = arith.constant 1.000000e+00 : f32
    %44 = vector.broadcast %cst_20 : f32 to vector<16x512xf32>
    %45 = arith.subf %44, %43 : vector<16x512xf32>
    %46 = arith.mulf %17, %45 : vector<16x512xf32>
    %cst_21 = arith.constant 1.000000e+00 : f32
    %47 = vector.broadcast %cst_21 : f32 to vector<16x512xf32>
    %48 = arith.addf %47, %46 : vector<16x512xf32>
    %49 = arith.mulf %10, %48 : vector<16x512xf32>
    %c0_22 = arith.constant 0 : index
    %c0_23 = arith.constant 0 : index
    %50 = vector.load %arg8[%c0_22, %c0_23] : memref<16x384xf32, #tpu.memory_space<vmem>>, vector<16x384xf32>
    %c0_24 = arith.constant 0 : index
    %c0_25 = arith.constant 0 : index
    %51 = vector.load %arg5[%c0_24, %c0_25] : memref<512x384xf32, #tpu.memory_space<vmem>>, vector<512x384xf32>
    %cst_26 = arith.constant dense<0.000000e+00> : vector<16x384xf32>
    %52 = tpu.matmul %49, %51, %cst_26 {dimension_numbers = #tpu.dot_dimension_numbers<[1], [0], [0], [1], [0, 0, 1, 1], [], []>} : vector<16x512xf32>, vector<512x384xf32>, vector<16x384xf32> -> vector<16x384xf32>
    %53 = arith.addf %50, %52 : vector<16x384xf32>
    %c0_27 = arith.constant 0 : index
    %c0_28 = arith.constant 0 : index
    %54 = vector.load %arg8[%c0_27, %c0_28] : memref<16x384xf32, #tpu.memory_space<vmem>>, vector<16x384xf32>
    tpu.vector_store %arg8[%c0_27, %c0_28], %53 {strides = array<i32>} : memref<16x384xf32, #tpu.memory_space<vmem>>, vector<16x384xf32>,
    %c0_i32_29 = arith.constant 0 : i32
    %55 = arith.cmpi eq, %arg1, %c0_i32_29 : i32
    %56 = arith.extui %55 : i1 to i32
    %c0_i32_30 = arith.constant 0 : i32
    %57 = arith.cmpi ne, %56, %c0_i32_30 : i32
    scf.if %57 {
      %c0_31 = arith.constant 0 : index
      %c0_32 = arith.constant 0 : index
      %58 = vector.load %arg8[%c0_31, %c0_32] : memref<16x384xf32, #tpu.memory_space<vmem>>, vector<16x384xf32>
      %c0_33 = arith.constant 0 : index
      %c0_34 = arith.constant 0 : index
      %59 = vector.load %arg6[%c0_33, %c0_34] : memref<1x384xf32, #tpu.memory_space<vmem>>, vector<1x384xf32>
      %60 = vector.broadcast %59 : vector<1x384xf32> to vector<16x384xf32>
      %61 = arith.addf %58, %60 : vector<16x384xf32>
      %c0_35 = arith.constant 0 : index
      %c0_36 = arith.constant 0 : index
      %62 = vector.load %arg7[%c0_35, %c0_36] : memref<16x384xf32, #tpu.memory_space<vmem>>, vector<16x384xf32>
      tpu.vector_store %arg7[%c0_35, %c0_36], %61 {strides = array<i32>} : memref<16x384xf32, #tpu.memory_space<vmem>>, vector<16x384xf32>,
    } else {
    }
    return
  }
  func.func @transform_0(%arg0: i32, %arg1: i32) -> (i32, i32) {
    %c0_i32 = arith.constant 0 : i32
    %c0_i32_0 = arith.constant 0 : i32
    return %arg0, %c0_i32 : i32, i32
  }
  func.func @transform_1(%arg0: i32, %arg1: i32) -> (i32, i32) {
    %c0_i32 = arith.constant 0 : i32
    %c0_i32_0 = arith.constant 0 : i32
    return %c0_i32, %arg1 : i32, i32
  }
  func.func @transform_2(%arg0: i32, %arg1: i32) -> (i32, i32) {
    %c0_i32 = arith.constant 0 : i32
    %c0_i32_0 = arith.constant 0 : i32
    return %c0_i32, %arg1 : i32, i32
  }
  func.func @transform_3(%arg0: i32, %arg1: i32) -> (i32, i32) {
    %c0_i32 = arith.constant 0 : i32
    %c0_i32_0 = arith.constant 0 : i32
    return %arg1, %c0_i32 : i32, i32
  }
  func.func @transform_4(%arg0: i32, %arg1: i32) -> (i32, i32) {
    %c0_i32 = arith.constant 0 : i32
    %c0_i32_0 = arith.constant 0 : i32
    %c0_i32_1 = arith.constant 0 : i32
    return %c0_i32, %c0_i32_0 : i32, i32
  }
  func.func @transform_5(%arg0: i32, %arg1: i32) -> (i32, i32) {
    %c0_i32 = arith.constant 0 : i32
    %c0_i32_0 = arith.constant 0 : i32
    return %arg0, %c0_i32 : i32, i32
  }
}

</mosaic_0001>

<bundles_post_ra>
// kernel: tpu_custom_call.1
= control target key start
LH: loop header
LB: loop body
LE: loop exit
PB: predicated region body
PF: predicated region fallthrough
CT: control target
= control target key end

     0   :  { %10 = vsyncpa [#allocation4], 0  ;;  %s2277_s0 = inlined_call_operand.hbm [shape: f32[16,384], index: 0, kind: input, shape index: {}]   ;;  %s2278_s1 = inlined_call_operand.hbm [shape: f32[384,512], index: 1, kind: input, shape index: {}]   ;;  %s2279_s2 = inlined_call_operand.vmem [shape: f32[1,512], index: 2, kind: input, shape index: {}]   ;;  %s2280_s3 = inlined_call_operand.hbm [shape: f32[512,384], index: 3, kind: input, shape index: {}]   ;;  %s2281_s4 = inlined_call_operand.vmem [shape: f32[1,384], index: 4, kind: input, shape index: {}]   ;;  %s2282_s5 = inlined_call_operand.hbm [shape: f32[16,384], index: 5, kind: output, shape index: {}]  }
   0x1   :  { %11 = vsyncpa [#allocation7], 0 }
   0x2   :  { %12 = vsyncpa [#allocation5], 0  ;;  %s2002_s18 = smov [#allocation6]   ;;  %s1908_s22 = scalar_lea.hbm %s2278_s1, 24576 }
   0x3   :  { %s30_s19 = sshll.u32 %s2002_s18, 4  ;;  %p1909_p0 = scmp.ne.s32.totalorder %s2278_s1, %s1908_s22  ;;  %s31_s19 = int_to_ptr.vmem [resolvable:$true] %s30_s19 }
   0x4   :  { %p1912_p1 = scmp.lt.u32.totalorder %s1908_s22, %s2278_s1 }
   0x6   :  { %p1914_p2 = pnand %p1912_p1, %p1909_p0 }
   0x8   :  { %1917 = shalt.err (!%p1914_p2)
}
   0x9   :  { %s1918_s27 = scalar_lea.vmem %s31_s19, 24576  ;;  %p1923_p4 = scmp.lt.s32.totalorder %s31_s19, %s31_s19 }
   0xa   :  { %p1919_p3 = scmp.ne.s32.totalorder %s31_s19, %s1918_s27  ;;  %p1924_p5 = scmp.lt.s32.totalorder %s1918_s27, %s1918_s27 }
   0xc   :  { %p1925_p6 = por %p1924_p5, %p1923_p4 }
   0xe   :  { %p1926_p7 = pnand %p1925_p6, %p1919_p3 }
  0x10   :  { %1929 = shalt.err (!%p1926_p7)
}
  0x11   :  { %s2003_s28 = smov 512   ;;  %s2004_s29 = smov 32  }
  0x12   :  { %36 = dma.hbm_to_vmem [thread:$0]  %s2278_s1, 24576, %s31_s19, [#allocation7], %s2003_s28, %s2003_s28, %s2004_s29  }
  0x13   :  { %s2005_s7 = smov [#allocation3]   ;;  %s1930_s11 = scalar_lea.hbm %s2277_s0, 768 }
  0x14   :  { %s18_s8 = sshll.u32 %s2005_s7, 4  ;;  %p1931_p8 = scmp.ne.s32.totalorder %s2277_s0, %s1930_s11  ;;  %s19_s8 = int_to_ptr.vmem [resolvable:$true] %s18_s8 }
  0x15   :  { %p1934_p9 = scmp.lt.u32.totalorder %s1930_s11, %s2277_s0 }
  0x17   :  { %p1936_p10 = pnand %p1934_p9, %p1931_p8 }
  0x19   :  { %1939 = shalt.err (!%p1936_p10)
}
  0x1a   :  { %s1940_s16 = scalar_lea.vmem %s19_s8, 768  ;;  %p1945_p12 = scmp.lt.s32.totalorder %s19_s8, %s19_s8 }
  0x1b   :  { %p1941_p11 = scmp.ne.s32.totalorder %s19_s8, %s1940_s16  ;;  %p1946_p13 = scmp.lt.s32.totalorder %s1940_s16, %s1940_s16 }
  0x1d   :  { %p1947_p0 = por %p1946_p13, %p1945_p12 }
  0x1f   :  { %p1948_p1 = pnand %p1947_p0, %p1941_p11 }
  0x21   :  { %1951 = shalt.err (!%p1948_p1)
}
  0x22   :  { %s2006_s1 = smov 384   ;;  %s2007_s17 = smov 24  }
  0x23   :  { %24 = dma.hbm_to_vmem [thread:$0]  %s2277_s0, 768, %s19_s8, [#allocation4], %s2006_s1, %s2006_s1, %s2007_s17  }
  0x24   :  { %s2008_s20 = smov [#allocation8]   ;;  %s1952_s24 = scalar_lea.hbm %s2280_s3, 24576 }
  0x25   :  { %s44_s21 = sshll.u32 %s2008_s20, 4  ;;  %p1953_p2 = scmp.ne.s32.totalorder %s2280_s3, %s1952_s24  ;;  %s45_s21 = int_to_ptr.vmem [resolvable:$true] %s44_s21 }
  0x26   :  { %p1956_p3 = scmp.lt.u32.totalorder %s1952_s24, %s2280_s3 }
  0x28   :  { %p1958_p4 = pnand %p1956_p3, %p1953_p2 }
  0x2a   :  { %1961 = shalt.err (!%p1958_p4)
}
  0x2b   :  { %s1962_s29 = scalar_lea.vmem %s45_s21, 24576  ;;  %p1967_p6 = scmp.lt.s32.totalorder %s45_s21, %s45_s21 }
  0x2c   :  { %p1963_p5 = scmp.ne.s32.totalorder %s45_s21, %s1962_s29  ;;  %p1968_p7 = scmp.lt.s32.totalorder %s1962_s29, %s1962_s29 }
  0x2e   :  { %p1969_p8 = por %p1968_p7, %p1967_p6 }
  0x30   :  { %p1970_p9 = pnand %p1969_p8, %p1963_p5 }
  0x32   :  { %1973 = shalt.err (!%p1970_p9)
}
  0x33   :  { %50 = dma.hbm_to_vmem [thread:$0]  %s2280_s3, 24576, %s45_s21, [#allocation7], %s2006_s1, %s2006_s1, %s2007_s17  }
  0x34   :  { %1996 = dma.done.wait [#allocation4], 768  }
  0x35   :  { %1997 = vsyncadd [#allocation4], 4294966528 }
  0x36   :  { %1998 = dma.done.wait [#allocation7], 49152  }
  0x37   :  { %1999 = vsyncadd [#allocation7], 4294918144  ;;  %v2009_v0 = vmov 0.0   ;;  %v79_v1 = vld [vmem:[#allocation6 + $0x8] sm:$0xff]  ;;  %v78_v6 = vld [vmem:[#allocation6] sm:$0xff] }
  0x38   :  { %433 = vmatprep.mubr.f32.mxu1 %v2009_v0  ;;  %v83_v2 = vld [vmem:[#allocation6 + $0x28] sm:$0xff]  ;;  %v82_v7 = vld [vmem:[#allocation6 + $0x20] sm:$0xff] }
  0x39   :  { %v207_v3 = vld [vmem:[#allocation6 + $0x408] sm:$0xff]  ;;  %v1462_v4 = vpack.c.bf16 %v83_v2, %v79_v1  ;;  %v1464_v9 = vpack.c.bf16 %v82_v7, %v78_v6  ;;  %v206_v10 = vld [vmem:[#allocation6 + $0x400] sm:$0xff] }
  0x3a   :  { %v211_v5 = vld [vmem:[#allocation6 + $0x428] sm:$0xff]  ;;  %v210_v11 = vld [vmem:[#allocation6 + $0x420] sm:$0xff] }
  0x3b   :  { %v1526_v8 = vpack.c.bf16 %v211_v5, %v207_v3  ;;  %v87_v12 = vld [vmem:[#allocation6 + $0x48] sm:$0xff]  ;;  %1463 = vmatprep.subr.bf16.mxu0 %v1462_v4  ;;  %v1528_v13 = vpack.c.bf16 %v210_v11, %v206_v10  ;;  %v86_v19 = vld [vmem:[#allocation6 + $0x40] sm:$0xff] }
  0x3c   :  { %v91_v14 = vld [vmem:[#allocation6 + $0x68] sm:$0xff]  ;;  %1465 = vmatpush1.bf16.msra.mxu0 %v1464_v9  ;;  %v90_v20 = vld [vmem:[#allocation6 + $0x60] sm:$0xff] }
  0x3d   :  { %v215_v15 = vld [vmem:[#allocation6 + $0x448] sm:$0xff]  ;;  %1527 = vmatprep.subr.bf16.mxu1 %v1526_v8  ;;  %v1466_v17 = vpack.c.bf16 %v91_v14, %v87_v12  ;;  %v214_v21 = vld [vmem:[#allocation6 + $0x440] sm:$0xff]  ;;  %v1468_v22 = vpack.c.bf16 %v90_v20, %v86_v19 }
  0x3e   :  { %v219_v16 = vld [vmem:[#allocation6 + $0x468] sm:$0xff]  ;;  %1529 = vmatpush1.bf16.msra.mxu1 %v1528_v13  ;;  %v218_v23 = vld [vmem:[#allocation6 + $0x460] sm:$0xff] }
  0x3f   :  { %v1530_v18 = vpack.c.bf16 %v219_v16, %v215_v15  ;;  %v95_v24 = vld [vmem:[#allocation6 + $0x88] sm:$0xff]  ;;  %1467 = vmatprep.subr.bf16.mxu0 %v1466_v17  ;;  %v1532_v26 = vpack.c.bf16 %v218_v23, %v214_v21  ;;  %v94_v30 = vld [vmem:[#allocation6 + $0x80] sm:$0xff] }
  0x40   :  { %v99_v25 = vld [vmem:[#allocation6 + $0xa8] sm:$0xff]  ;;  %v98_v32 = vld [vmem:[#allocation6 + $0xa0] sm:$0xff]  ;;  %1469 = vmatpush1.bf16.msra.mxu0 %v1468_v22 }
  0x41   :  { %1531 = vmatprep.subr.bf16.mxu1 %v1530_v18  ;;  %v1470_v27 = vpack.c.bf16 %v99_v25, %v95_v24  ;;  %v223_v28 = vld [vmem:[#allocation6 + $0x488] sm:$0xff]  ;;  %v222_v33 = vld [vmem:[#allocation6 + $0x480] sm:$0xff]  ;;  %v1472_v35 = vpack.c.bf16 %v98_v32, %v94_v30 }
  0x42   :  { %v227_v29 = vld [vmem:[#allocation6 + $0x4a8] sm:$0xff]  ;;  %v226_v34 = vld [vmem:[#allocation6 + $0x4a0] sm:$0xff]  ;;  %1533 = vmatpush1.bf16.msra.mxu1 %v1532_v26 }
  0x43   :  { %v1534_v31 = vpack.c.bf16 %v227_v29, %v223_v28  ;;  %v103_v36 = vld [vmem:[#allocation6 + $0xc8] sm:$0xff]  ;;  %1471 = vmatprep.subr.bf16.mxu0 %v1470_v27  ;;  %v1536_v39 = vpack.c.bf16 %v226_v34, %v222_v33  ;;  %v102_v42 = vld [vmem:[#allocation6 + $0xc0] sm:$0xff]  ;;  %v81_v34 = vld [vmem:[#allocation6 + $0x18] sm:$0xff] }
  0x44   :  { %v107_v37 = vld [vmem:[#allocation6 + $0xe8] sm:$0xff]  ;;  %v106_v43 = vld [vmem:[#allocation6 + $0xe0] sm:$0xff]  ;;  %1473 = vmatpush1.bf16.msra.mxu0 %v1472_v35  ;;  %v85_v35 = vld [vmem:[#allocation6 + $0x38] sm:$0xff] }
  0x45   :  { %v231_v38 = vld [vmem:[#allocation6 + $0x4c8] sm:$0xff]  ;;  %v1474_v40 = vpack.c.bf16 %v107_v37, %v103_v36  ;;  %1535 = vmatprep.subr.bf16.mxu1 %v1534_v31  ;;  %v230_v45 = vld [vmem:[#allocation6 + $0x4c0] sm:$0xff]  ;;  %v1476_v51 = vpack.c.bf16 %v106_v43, %v102_v42  ;;  %v1558_v42 = vpack.c.bf16 %v85_v35, %v81_v34  ;;  %v84_v43 = vld [vmem:[#allocation6 + $0x30] sm:$0xff] }
  0x46   :  { %v235_v41 = vld [vmem:[#allocation6 + $0x4e8] sm:$0xff]  ;;  %v234_v46 = vld [vmem:[#allocation6 + $0x4e0] sm:$0xff]  ;;  %1537 = vmatpush1.bf16.msra.mxu1 %v1536_v39  ;;  %v125_v34 = vld [vmem:[#allocation6 + $0x178] sm:$0xff] }
  0x47   :  { %v1538_v44 = vpack.c.bf16 %v235_v41, %v231_v38  ;;  %v111_v47 = vld [vmem:[#allocation6 + $0x108] sm:$0xff]  ;;  %1475 = vmatprep.subr.bf16.mxu0 %v1474_v40  ;;  %v1540_v52 = vpack.c.bf16 %v234_v46, %v230_v45  ;;  %v110_v54 = vld [vmem:[#allocation6 + $0x100] sm:$0xff]  ;;  %v80_v41 = vld [vmem:[#allocation6 + $0x10] sm:$0xff] }
  0x48   :  { %v115_v48 = vld [vmem:[#allocation6 + $0x128] sm:$0xff]  ;;  %v114_v55 = vld [vmem:[#allocation6 + $0x120] sm:$0xff]  ;;  %1477 = vmatpush1.bf16.msra.mxu0 %v1476_v51  ;;  %v89_v46 = vld [vmem:[#allocation6 + $0x58] sm:$0xff] }
  0x49   :  { %v239_v49 = vld [vmem:[#allocation6 + $0x508] sm:$0xff]  ;;  %v1478_v53 = vpack.c.bf16 %v115_v48, %v111_v47  ;;  %v238_v56 = vld [vmem:[#allocation6 + $0x500] sm:$0xff]  ;;  %1539 = vmatprep.subr.bf16.mxu1 %v1538_v44  ;;  %v1480_v63 = vpack.c.bf16 %v114_v55, %v110_v54  ;;  %v93_v47 = vld [vmem:[#allocation6 + $0x78] sm:$0xff] }
  0x4a   :  { %v243_v50 = vld [vmem:[#allocation6 + $0x528] sm:$0xff]  ;;  %v242_v58 = vld [vmem:[#allocation6 + $0x520] sm:$0xff]  ;;  %1541 = vmatpush1.bf16.msra.mxu1 %v1540_v52  ;;  %v88_v54 = vld [vmem:[#allocation6 + $0x50] sm:$0xff]  ;;  %v1562_v55 = vpack.c.bf16 %v93_v47, %v89_v46 }
  0x4b   :  { %v1542_v57 = vpack.c.bf16 %v243_v50, %v239_v49  ;;  %v119_v59 = vld [vmem:[#allocation6 + $0x148] sm:$0xff]  ;;  %1479 = vmatprep.subr.bf16.mxu0 %v1478_v53  ;;  %v1544_v1 = vpack.c.bf16 %v242_v58, %v238_v56  ;;  %v118_v3 = vld [vmem:[#allocation6 + $0x140] sm:$0xff]  ;;  %v1560_v50 = vpack.c.bf16 %v84_v43, %v80_v41  ;;  %v92_v56 = vld [vmem:[#allocation6 + $0x70] sm:$0xff] }
  0x4c   :  { %v123_v60 = vld [vmem:[#allocation6 + $0x168] sm:$0xff]  ;;  %v122_v4 = vld [vmem:[#allocation6 + $0x160] sm:$0xff]  ;;  %1481 = vmatpush1.bf16.msra.mxu0 %v1480_v63  ;;  %v2089_v35 = vld [vmem:[#allocation3 + $0x28] sm:$0xff] }
  0x4d   :  { %v247_v61 = vld [vmem:[#allocation6 + $0x548] sm:$0xff]  ;;  %v1482_v2 = vpack.c.bf16 %v123_v60, %v119_v59  ;;  %v246_v5 = vld [vmem:[#allocation6 + $0x540] sm:$0xff]  ;;  %1543 = vmatprep.subr.bf16.mxu1 %v1542_v57  ;;  %v1484_v12 = vpack.c.bf16 %v122_v4, %v118_v3  ;;  %v97_v59 = vld [vmem:[#allocation6 + $0x98] sm:$0xff] }
  0x4e   :  { %v251_v62 = vld [vmem:[#allocation6 + $0x568] sm:$0xff]  ;;  %v250_v7 = vld [vmem:[#allocation6 + $0x560] sm:$0xff]  ;;  %1545 = vmatpush1.bf16.msra.mxu1 %v1544_v1  ;;  %v101_v60 = vld [vmem:[#allocation6 + $0xb8] sm:$0xff] }
  0x4f   :  { %v1546_v6 = vpack.c.bf16 %v251_v62, %v247_v61  ;;  %v127_v8 = vld [vmem:[#allocation6 + $0x188] sm:$0xff]  ;;  %1483 = vmatprep.subr.bf16.mxu0 %v1482_v2  ;;  %v1548_v13 = vpack.c.bf16 %v250_v7, %v246_v5  ;;  %v126_v15 = vld [vmem:[#allocation6 + $0x180] sm:$0xff]  ;;  %v1564_v62 = vpack.c.bf16 %v92_v56, %v88_v54  ;;  %v96_v3 = vld [vmem:[#allocation6 + $0x90] sm:$0xff]  ;;  %v1566_v4 = vpack.c.bf16 %v101_v60, %v97_v59 }
  0x50   :  { %v131_v9 = vld [vmem:[#allocation6 + $0x1a8] sm:$0xff]  ;;  %v130_v16 = vld [vmem:[#allocation6 + $0x1a0] sm:$0xff]  ;;  %1485 = vmatpush1.bf16.msra.mxu0 %v1484_v12  ;;  %v100_v5 = vld [vmem:[#allocation6 + $0xb0] sm:$0xff] }
  0x51   :  { %v255_v10 = vld [vmem:[#allocation6 + $0x588] sm:$0xff]  ;;  %v1486_v14 = vpack.c.bf16 %v131_v9, %v127_v8  ;;  %v254_v17 = vld [vmem:[#allocation6 + $0x580] sm:$0xff]  ;;  %1547 = vmatprep.subr.bf16.mxu1 %v1546_v6  ;;  %v1488_v24 = vpack.c.bf16 %v130_v16, %v126_v15  ;;  %v105_v8 = vld [vmem:[#allocation6 + $0xd8] sm:$0xff] }
  0x52   :  { %v259_v11 = vld [vmem:[#allocation6 + $0x5a8] sm:$0xff]  ;;  %v258_v19 = vld [vmem:[#allocation6 + $0x5a0] sm:$0xff]  ;;  %1549 = vmatpush1.bf16.msra.mxu1 %v1548_v13  ;;  %v109_v9 = vld [vmem:[#allocation6 + $0xf8] sm:$0xff] }
  0x53   :  { %v1550_v18 = vpack.c.bf16 %v259_v11, %v255_v10  ;;  %v135_v20 = vld [vmem:[#allocation6 + $0x1c8] sm:$0xff]  ;;  %1487 = vmatprep.subr.bf16.mxu0 %v1486_v14  ;;  %v1552_v25 = vpack.c.bf16 %v258_v19, %v254_v17  ;;  %v134_v27 = vld [vmem:[#allocation6 + $0x1c0] sm:$0xff]  ;;  %v1568_v11 = vpack.c.bf16 %v100_v5, %v96_v3  ;;  %v104_v15 = vld [vmem:[#allocation6 + $0xd0] sm:$0xff]  ;;  %v1570_v16 = vpack.c.bf16 %v109_v9, %v105_v8 }
  0x54   :  { %v139_v21 = vld [vmem:[#allocation6 + $0x1e8] sm:$0xff]  ;;  %v138_v28 = vld [vmem:[#allocation6 + $0x1e0] sm:$0xff]  ;;  %1489 = vmatpush1.bf16.msra.mxu0 %v1488_v24  ;;  %v108_v17 = vld [vmem:[#allocation6 + $0xf0] sm:$0xff] }
  0x55   :  { %v263_v22 = vld [vmem:[#allocation6 + $0x5c8] sm:$0xff]  ;;  %v1490_v26 = vpack.c.bf16 %v139_v21, %v135_v20  ;;  %v262_v29 = vld [vmem:[#allocation6 + $0x5c0] sm:$0xff]  ;;  %1551 = vmatprep.subr.bf16.mxu1 %v1550_v18  ;;  %v1492_v36 = vpack.c.bf16 %v138_v28, %v134_v27  ;;  %v113_v20 = vld [vmem:[#allocation6 + $0x118] sm:$0xff]  ;;  %v1572_v24 = vpack.c.bf16 %v108_v17, %v104_v15 }
  0x56   :  { %v267_v23 = vld [vmem:[#allocation6 + $0x5e8] sm:$0xff]  ;;  %v266_v31 = vld [vmem:[#allocation6 + $0x5e0] sm:$0xff]  ;;  %1553 = vmatpush1.bf16.msra.mxu1 %v1552_v25  ;;  %v117_v21 = vld [vmem:[#allocation6 + $0x138] sm:$0xff] }
  0x57   :  { %v1554_v30 = vpack.c.bf16 %v267_v23, %v263_v22  ;;  %v143_v32 = vld [vmem:[#allocation6 + $0x208] sm:$0xff]  ;;  %1491 = vmatprep.subr.bf16.mxu0 %v1490_v26  ;;  %v1556_v37 = vpack.c.bf16 %v266_v31, %v262_v29  ;;  %v142_v39 = vld [vmem:[#allocation6 + $0x200] sm:$0xff]  ;;  %v73_v22 = vld [vmem:[#allocation3 + $0x8] sm:$0xff]  ;;  %v1574_v29 = vpack.c.bf16 %v117_v21, %v113_v20 }
  0x58   :  { %v147_v33 = vld [vmem:[#allocation6 + $0x228] sm:$0xff]  ;;  %v146_v40 = vld [vmem:[#allocation6 + $0x220] sm:$0xff]  ;;  %1493 = vmatpush1.bf16.msra.mxu0 %v1492_v36  ;;  %356 = vmatprep.mubr.f32.mxu0 %v73_v22  ;;  %v112_v28 = vld [vmem:[#allocation6 + $0x110] sm:$0xff] }
  0x59   :  { %v1494_v38 = vpack.c.bf16 %v147_v33, %v143_v32  ;;  %1555 = vmatprep.subr.bf16.mxu1 %v1554_v30  ;;  %v151_v44 = vld [vmem:[#allocation6 + $0x248] sm:$0xff]  ;;  %v2085_v48 = vld [vmem:[#allocation3 + $0x10] sm:$0xff]  ;;  %v1496_v49 = vpack.c.bf16 %v146_v40, %v142_v39  ;;  %v116_v30 = vld [vmem:[#allocation6 + $0x130] sm:$0xff] }
  0x5a   :  { %v155_v45 = vld [vmem:[#allocation6 + $0x268] sm:$0xff]  ;;  %1557 = vmatpush1.bf16.msra.mxu1 %v1556_v37  ;;  %v150_v52 = vld [vmem:[#allocation6 + $0x240] sm:$0xff]  ;;  %v121_v33 = vld [vmem:[#allocation6 + $0x158] sm:$0xff]  ;;  %v1576_v37 = vpack.c.bf16 %v116_v30, %v112_v28 }
  0x5b   :  { %1495 = vmatprep.subr.bf16.mxu0 %v1494_v38  ;;  %v1498_v51 = vpack.c.bf16 %v155_v45, %v151_v44  ;;  %v154_v53 = vld [vmem:[#allocation6 + $0x260] sm:$0xff]  ;;  %1559 = vmatprep.subr.bf16.mxu1 %v1558_v42  ;;  %v159_v57 = vld [vmem:[#allocation6 + $0x288] sm:$0xff]  ;;  %v120_v41 = vld [vmem:[#allocation6 + $0x150] sm:$0xff]  ;;  %v1578_v42 = vpack.c.bf16 %v125_v34, %v121_v33 }
  0x5c   :  { %v163_v58 = vld [vmem:[#allocation6 + $0x2a8] sm:$0xff]  ;;  %1497 = vmatpush1.bf16.msra.mxu0 %v1496_v49  ;;  %v1500_v61 = vpack.c.bf16 %v154_v53, %v150_v52  ;;  %v158_v1 = vld [vmem:[#allocation6 + $0x280] sm:$0xff]  ;;  %v124_v43 = vld [vmem:[#allocation6 + $0x170] sm:$0xff] }
  0x5d   :  { %434 = vmatmul.mubr.f32.vlgmr.msra.gmra.mrb[0].mxu1 %v2085_v48  ;;  %1499 = vmatprep.subr.bf16.mxu0 %v1498_v51  ;;  %v1502_v63 = vpack.c.bf16 %v163_v58, %v159_v57  ;;  %v162_v2 = vld [vmem:[#allocation6 + $0x2a0] sm:$0xff]  ;;  %v167_v6 = vld [vmem:[#allocation6 + $0x2c8] sm:$0xff]  ;;  %v129_v46 = vld [vmem:[#allocation6 + $0x198] sm:$0xff] }
  0x5e   :  { %1561 = vmatpush1.bf16.msra.mxu1 %v1560_v50  ;;  %v171_v7 = vld [vmem:[#allocation6 + $0x2e8] sm:$0xff]  ;;  %439 = vmatprep.mubr.f32.mxu1 %v2009_v0  ;;  %v1504_v10 = vpack.c.bf16 %v162_v2, %v158_v1  ;;  %v166_v13 = vld [vmem:[#allocation6 + $0x2c0] sm:$0xff]  ;;  %v133_v47 = vld [vmem:[#allocation6 + $0x1b8] sm:$0xff]  ;;  %v1580_v50 = vpack.c.bf16 %v124_v43, %v120_v41 }
  0x5f   :  { %1563 = vmatprep.subr.bf16.mxu1 %v1562_v55  ;;  %v1506_v12 = vpack.c.bf16 %v171_v7, %v167_v6  ;;  %v170_v14 = vld [vmem:[#allocation6 + $0x2e0] sm:$0xff]  ;;  %v175_v18 = vld [vmem:[#allocation6 + $0x308] sm:$0xff]  ;;  %v128_v54 = vld [vmem:[#allocation6 + $0x190] sm:$0xff]  ;;  %v1582_v55 = vpack.c.bf16 %v133_v47, %v129_v46 }
  0x60   :  { %1501 = vmatpush1.bf16.msra.mxu0 %v1500_v61  ;;  %v179_v19 = vld [vmem:[#allocation6 + $0x328] sm:$0xff]  ;;  %v1508_v23 = vpack.c.bf16 %v170_v14, %v166_v13  ;;  %v174_v26 = vld [vmem:[#allocation6 + $0x300] sm:$0xff]  ;;  %v132_v56 = vld [vmem:[#allocation6 + $0x1b0] sm:$0xff] }
  0x61   :  { %1503 = vmatprep.subr.bf16.mxu0 %v1502_v63  ;;  %v1510_v25 = vpack.c.bf16 %v179_v19, %v175_v18  ;;  %v178_v27 = vld [vmem:[#allocation6 + $0x320] sm:$0xff]  ;;  %v183_v31 = vld [vmem:[#allocation6 + $0x348] sm:$0xff]  ;;  %440 = vmatmul.mubr.f32.gmra.mrb[2].mxu1 %v2089_v35  ;;  %v137_v59 = vld [vmem:[#allocation6 + $0x1d8] sm:$0xff] }
  0x62   :  { %1565 = vmatpush1.bf16.msra.mxu1 %v1564_v62  ;;  %v187_v32 = vld [vmem:[#allocation6 + $0x368] sm:$0xff]  ;;  %v1512_v36 = vpack.c.bf16 %v178_v27, %v174_v26  ;;  %v182_v39 = vld [vmem:[#allocation6 + $0x340] sm:$0xff]  ;;  %510 = vmatprep.mubr.f32.mxu1 %v73_v22  ;;  %v141_v60 = vld [vmem:[#allocation6 + $0x1f8] sm:$0xff]  ;;  %v1584_v62 = vpack.c.bf16 %v132_v56, %v128_v54 }
  0x63   :  { %1567 = vmatprep.subr.bf16.mxu1 %v1566_v4  ;;  %v1514_v38 = vpack.c.bf16 %v187_v32, %v183_v31  ;;  %v186_v40 = vld [vmem:[#allocation6 + $0x360] sm:$0xff]  ;;  %v191_v44 = vld [vmem:[#allocation6 + $0x388] sm:$0xff]  ;;  %v1586_v3 = vpack.c.bf16 %v141_v60, %v137_v59  ;;  %v136_v4 = vld [vmem:[#allocation6 + $0x1d0] sm:$0xff] }
  0x64   :  { %1505 = vmatpush1.bf16.msra.mxu0 %v1504_v10  ;;  %v195_v45 = vld [vmem:[#allocation6 + $0x3a8] sm:$0xff]  ;;  %v1516_v49 = vpack.c.bf16 %v186_v40, %v182_v39  ;;  %v190_v52 = vld [vmem:[#allocation6 + $0x380] sm:$0xff]  ;;  %v140_v5 = vld [vmem:[#allocation6 + $0x1f0] sm:$0xff] }
  0x65   :  { %1507 = vmatprep.subr.bf16.mxu0 %v1506_v12  ;;  %v1518_v51 = vpack.c.bf16 %v195_v45, %v191_v44  ;;  %v194_v53 = vld [vmem:[#allocation6 + $0x3a0] sm:$0xff]  ;;  %v199_v57 = vld [vmem:[#allocation6 + $0x3c8] sm:$0xff]  ;;  %v145_v6 = vld [vmem:[#allocation6 + $0x218] sm:$0xff]  ;;  %v1588_v9 = vpack.c.bf16 %v140_v5, %v136_v4 }
  0x66   :  { %1569 = vmatpush1.bf16.msra.mxu1 %v1568_v11  ;;  %v203_v58 = vld [vmem:[#allocation6 + $0x3e8] sm:$0xff]  ;;  %v1520_v61 = vpack.c.bf16 %v194_v53, %v190_v52  ;;  %v198_v1 = vld [vmem:[#allocation6 + $0x3c0] sm:$0xff]  ;;  %v149_v7 = vld [vmem:[#allocation6 + $0x238] sm:$0xff] }
  0x67   :  { %1571 = vmatprep.subr.bf16.mxu1 %v1570_v16  ;;  %v1522_v63 = vpack.c.bf16 %v203_v58, %v199_v57  ;;  %v202_v2 = vld [vmem:[#allocation6 + $0x3e0] sm:$0xff]  ;;  %v1590_v10 = vpack.c.bf16 %v149_v7, %v145_v6  ;;  %v144_v11 = vld [vmem:[#allocation6 + $0x210] sm:$0xff]  ;;  %v153_v13 = vld [vmem:[#allocation6 + $0x258] sm:$0xff] }
  0x68   :  { %1509 = vmatpush1.bf16.msra.mxu0 %v1508_v23  ;;  %v1524_v8 = vpack.c.bf16 %v202_v2, %v198_v1  ;;  %v148_v12 = vld [vmem:[#allocation6 + $0x230] sm:$0xff]  ;;  %v157_v14 = vld [vmem:[#allocation6 + $0x278] sm:$0xff]  ;;  %v2098_v23 = vld [vmem:[#allocation3 + $0x18] sm:$0xff] }
  0x69   :  { %1511 = vmatprep.subr.bf16.mxu0 %v1510_v25  ;;  %v2092_v15 = vld [vmem:[#allocation3] sm:$0xff]  ;;  %v1592_v16 = vpack.c.bf16 %v148_v12, %v144_v11  ;;  %v1594_v18 = vpack.c.bf16 %v157_v14, %v153_v13  ;;  %v161_v21 = vld [vmem:[#allocation6 + $0x298] sm:$0xff] }
  0x6a   :  { %1573 = vmatpush1.bf16.msra.mxu1 %v1572_v24  ;;  %v2094_v17 = vld [vmem:[#allocation3 + $0x20] sm:$0xff]  ;;  %v165_v22 = vld [vmem:[#allocation6 + $0x2b8] sm:$0xff] }
  0x6b   :  { %1575 = vmatprep.subr.bf16.mxu1 %v1574_v29  ;;  %v152_v19 = vld [vmem:[#allocation6 + $0x250] sm:$0xff]  ;;  %v1598_v25 = vpack.c.bf16 %v165_v22, %v161_v21  ;;  %v169_v28 = vld [vmem:[#allocation6 + $0x2d8] sm:$0xff] }
  0x6c   :  { %1513 = vmatpush1.bf16.msra.mxu0 %v1512_v36  ;;  %v156_v20 = vld [vmem:[#allocation6 + $0x270] sm:$0xff]  ;;  %v173_v29 = vld [vmem:[#allocation6 + $0x2f8] sm:$0xff] }
  0x6d   :  { %1515 = vmatprep.subr.bf16.mxu0 %v1514_v38  ;;  %v1596_v24 = vpack.c.bf16 %v156_v20, %v152_v19  ;;  %v160_v26 = vld [vmem:[#allocation6 + $0x290] sm:$0xff]  ;;  %v1602_v31 = vpack.c.bf16 %v173_v29, %v169_v28  ;;  %v177_v34 = vld [vmem:[#allocation6 + $0x318] sm:$0xff] }
  0x6e   :  { %1577 = vmatpush1.bf16.msra.mxu1 %v1576_v37  ;;  %v164_v27 = vld [vmem:[#allocation6 + $0x2b0] sm:$0xff]  ;;  %v181_v36 = vld [vmem:[#allocation6 + $0x338] sm:$0xff] }
  0x6f   :  { %1579 = vmatprep.subr.bf16.mxu1 %v1578_v42  ;;  %v1600_v30 = vpack.c.bf16 %v164_v27, %v160_v26  ;;  %v168_v32 = vld [vmem:[#allocation6 + $0x2d0] sm:$0xff]  ;;  %v1606_v38 = vpack.c.bf16 %v181_v36, %v177_v34  ;;  %v185_v41 = vld [vmem:[#allocation6 + $0x358] sm:$0xff] }
  0x70   :  { %1517 = vmatpush1.bf16.msra.mxu0 %v1516_v49  ;;  %v172_v33 = vld [vmem:[#allocation6 + $0x2f0] sm:$0xff]  ;;  %v189_v42 = vld [vmem:[#allocation6 + $0x378] sm:$0xff] }
  0x71   :  { %1519 = vmatprep.subr.bf16.mxu0 %v1518_v51  ;;  %v1604_v37 = vpack.c.bf16 %v172_v33, %v168_v32  ;;  %v176_v39 = vld [vmem:[#allocation6 + $0x310] sm:$0xff]  ;;  %v1610_v44 = vpack.c.bf16 %v189_v42, %v185_v41  ;;  %v193_v47 = vld [vmem:[#allocation6 + $0x398] sm:$0xff] }
  0x72   :  { %1581 = vmatpush1.bf16.msra.mxu1 %v1580_v50  ;;  %v180_v40 = vld [vmem:[#allocation6 + $0x330] sm:$0xff]  ;;  %v197_v49 = vld [vmem:[#allocation6 + $0x3b8] sm:$0xff] }
  0x73   :  { %1583 = vmatprep.subr.bf16.mxu1 %v1582_v55  ;;  %v1608_v43 = vpack.c.bf16 %v180_v40, %v176_v39  ;;  %v184_v45 = vld [vmem:[#allocation6 + $0x350] sm:$0xff]  ;;  %v1614_v51 = vpack.c.bf16 %v197_v49, %v193_v47  ;;  %v201_v54 = vld [vmem:[#allocation6 + $0x3d8] sm:$0xff] }
  0x74   :  { %1521 = vmatpush1.bf16.msra.mxu0 %v1520_v61  ;;  %v188_v46 = vld [vmem:[#allocation6 + $0x370] sm:$0xff]  ;;  %v205_v55 = vld [vmem:[#allocation6 + $0x3f8] sm:$0xff] }
  0x75   :  { %1523 = vmatprep.subr.bf16.mxu0 %v1522_v63  ;;  %v1612_v50 = vpack.c.bf16 %v188_v46, %v184_v45  ;;  %v192_v52 = vld [vmem:[#allocation6 + $0x390] sm:$0xff]  ;;  %v1618_v57 = vpack.c.bf16 %v205_v55, %v201_v54  ;;  %v209_v60 = vld [vmem:[#allocation6 + $0x418] sm:$0xff]  ;;  %v826_v45 = vld [vmem:[#allocation8 + $0x20] sm:$0xff] }
  0x76   :  { %1585 = vmatpush1.bf16.msra.mxu1 %v1584_v62  ;;  %v196_v53 = vld [vmem:[#allocation6 + $0x3b0] sm:$0xff]  ;;  %v213_v61 = vld [vmem:[#allocation6 + $0x438] sm:$0xff]  ;;  %v822_v46 = vld [vmem:[#allocation8] sm:$0xff] }
  0x77   :  { %1587 = vmatprep.subr.bf16.mxu1 %v1586_v3  ;;  %v1616_v56 = vpack.c.bf16 %v196_v53, %v192_v52  ;;  %v200_v58 = vld [vmem:[#allocation6 + $0x3d0] sm:$0xff]  ;;  %v1622_v63 = vpack.c.bf16 %v213_v61, %v209_v60  ;;  %v217_v3 = vld [vmem:[#allocation6 + $0x458] sm:$0xff] }
  0x78   :  { %1525 = vmatpush1.bf16.msra.mxu0 %v1524_v8  ;;  %v204_v59 = vld [vmem:[#allocation6 + $0x3f0] sm:$0xff]  ;;  %v221_v4 = vld [vmem:[#allocation6 + $0x478] sm:$0xff] }
  0x79   :  { %v1620_v62 = vpack.c.bf16 %v204_v59, %v200_v58  ;;  %v208_v1 = vld [vmem:[#allocation6 + $0x410] sm:$0xff]  ;;  %v1626_v6 = vpack.c.bf16 %v221_v4, %v217_v3  ;;  %v241_v22 = vld [vmem:[#allocation6 + $0x518] sm:$0xff]  ;;  %v835_v58 = vld [vmem:[#allocation8 + $0x68] sm:$0xff] }
  0x7a   :  { %1589 = vmatpush1.bf16.msra.mxu1 %v1588_v9  ;;  %v212_v2 = vld [vmem:[#allocation6 + $0x430] sm:$0xff]  ;;  %v225_v9 = vld [vmem:[#allocation6 + $0x498] sm:$0xff]  ;;  %v838_v59 = vld [vmem:[#allocation8 + $0x80] sm:$0xff] }
  0x7b   :  { %1591 = vmatprep.subr.bf16.mxu1 %v1590_v10  ;;  %357 = vmatmul.mubr.f32.vlgmr.msra.gmra.mrb[0].mxu0 %v2092_v15  ;;  %v1624_v5 = vpack.c.bf16 %v212_v2, %v208_v1  ;;  %v216_v7 = vld [vmem:[#allocation6 + $0x450] sm:$0xff]  ;;  %v229_v10 = vld [vmem:[#allocation6 + $0x4b8] sm:$0xff] }
  0x7c   :  { %362 = vmatprep.mubr.f32.mxu0 %v2094_v17  ;;  %v220_v8 = vld [vmem:[#allocation6 + $0x470] sm:$0xff]  ;;  %v1630_v12 = vpack.c.bf16 %v229_v10, %v225_v9  ;;  %v249_v28 = vld [vmem:[#allocation6 + $0x558] sm:$0xff]  ;;  %v847_v9 = vld [vmem:[#allocation8 + $0xc8] sm:$0xff] }
  0x7d   :  { %v1628_v11 = vpack.c.bf16 %v220_v8, %v216_v7  ;;  %v224_v13 = vld [vmem:[#allocation6 + $0x490] sm:$0xff]  ;;  %v253_v29 = vld [vmem:[#allocation6 + $0x578] sm:$0xff]  ;;  %v843_v7 = vld [vmem:[#allocation8 + $0xa8] sm:$0xff] }
  0x7e   :  { %1593 = vmatpush1.bf16.msra.mxu1 %v1592_v16  ;;  %v228_v14 = vld [vmem:[#allocation6 + $0x4b0] sm:$0xff]  ;;  %v233_v16 = vld [vmem:[#allocation6 + $0x4d8] sm:$0xff]  ;;  %v850_v10 = vld [vmem:[#allocation8 + $0xe0] sm:$0xff] }
  0x7f   :  { %1595 = vmatprep.subr.bf16.mxu1 %v1594_v18  ;;  %363 = vmatmul.mubr.f32.gmra.mrb[2].mxu0 %v2098_v23  ;;  %v237_v18 = vld [vmem:[#allocation6 + $0x4f8] sm:$0xff]  ;;  %v1632_v19 = vpack.c.bf16 %v228_v14, %v224_v13  ;;  %v232_v21 = vld [vmem:[#allocation6 + $0x4d0] sm:$0xff] }
  0x80   :  { %v1634_v20 = vpack.c.bf16 %v237_v18, %v233_v16  ;;  %v240_v26 = vld [vmem:[#allocation6 + $0x510] sm:$0xff]  ;;  %v257_v33 = vld [vmem:[#allocation6 + $0x598] sm:$0xff]  ;;  %v855_v18 = vld [vmem:[#allocation8 + $0x108] sm:$0xff] }
  0x81   :  { %v244_v27 = vld [vmem:[#allocation6 + $0x530] sm:$0xff]  ;;  %v261_v34 = vld [vmem:[#allocation6 + $0x5b8] sm:$0xff] }
  0x82   :  { %1597 = vmatpush1.bf16.msra.mxu1 %v1596_v24  ;;  %v245_v24 = vld [vmem:[#allocation6 + $0x538] sm:$0xff]  ;;  %v252_v32 = vld [vmem:[#allocation6 + $0x570] sm:$0xff] }
  0x83   :  { %1599 = vmatprep.subr.bf16.mxu1 %v1598_v25  ;;  %v1638_v25 = vpack.c.bf16 %v245_v24, %v241_v22  ;;  %v260_v39 = vld [vmem:[#allocation6 + $0x5b0] sm:$0xff]  ;;  %v265_v40 = vld [vmem:[#allocation6 + $0x5d8] sm:$0xff]  ;;  %v858_v22 = vld [vmem:[#allocation8 + $0x120] sm:$0xff] }
  0x84   :  { %v269_v41 = vld [vmem:[#allocation6 + $0x5f8] sm:$0xff]  ;;  %v264_v42 = vld [vmem:[#allocation6 + $0x5d0] sm:$0xff] }
  0x85   :  { %v832_v52 = vld [vmem:[#allocation8 + $0x50] sm:$0xff]  ;;  %v1650_v53 = vpack.c.bf16 %v269_v41, %v265_v40  ;;  %v837_v1 = vld [vmem:[#allocation8 + $0x78] sm:$0xff]  ;;  %v827_v40 = vld [vmem:[#allocation8 + $0x28] sm:$0xff] }
  0x86   :  { %1601 = vmatpush1.bf16.msra.mxu1 %v1600_v30  ;;  %v1642_v30 = vpack.c.bf16 %v253_v29, %v249_v28  ;;  %v841_v3 = vld [vmem:[#allocation8 + $0x98] sm:$0xff]  ;;  %v844_v4 = vld [vmem:[#allocation8 + $0xb0] sm:$0xff]  ;;  %v867_v29 = vld [vmem:[#allocation8 + $0x168] sm:$0xff] }
  0x87   :  { %1603 = vmatprep.subr.bf16.mxu1 %v1602_v31  ;;  %v248_v31 = vld [vmem:[#allocation6 + $0x550] sm:$0xff]  ;;  %v849_v13 = vld [vmem:[#allocation8 + $0xd8] sm:$0xff] }
  0x88   :  { %v1644_v36 = vpack.c.bf16 %v252_v32, %v248_v31  ;;  %v861_v24 = vld [vmem:[#allocation8 + $0x138] sm:$0xff]  ;;  %v864_v28 = vld [vmem:[#allocation8 + $0x150] sm:$0xff]  ;;  %v874_v31 = vld [vmem:[#allocation8 + $0x1a0] sm:$0xff] }
  0x8a   :  { %1605 = vmatpush1.bf16.msra.mxu1 %v1604_v37  ;;  %v1646_v37 = vpack.c.bf16 %v261_v34, %v257_v33  ;;  %v870_v33 = vld [vmem:[#allocation8 + $0x180] sm:$0xff]  ;;  %v873_v34 = vld [vmem:[#allocation8 + $0x198] sm:$0xff] }
  0x8b   :  { %1607 = vmatprep.subr.bf16.mxu1 %v1606_v38  ;;  %v256_v38 = vld [vmem:[#allocation6 + $0x590] sm:$0xff] }
  0x8c   :  { %v1648_v47 = vpack.c.bf16 %v260_v39, %v256_v38  ;;  %v875_v38 = vld [vmem:[#allocation8 + $0x1a8] sm:$0xff]  ;;  %v824_v39 = vld [vmem:[#allocation8 + $0x10] sm:$0xff] }
  0x8e   :  { %1609 = vmatpush1.bf16.msra.mxu1 %v1608_v43  ;;  %v268_v43 = vld [vmem:[#allocation6 + $0x5f0] sm:$0xff] }
  0x8f   :  { %1611 = vmatprep.subr.bf16.mxu1 %v1610_v44  ;;  %v823_v44 = vld [vmem:[#allocation8 + $0x8] sm:$0xff]  ;;  %v1652_v61 = vpack.c.bf16 %v268_v43, %v264_v42  ;;  %v1784_v42 = vpack.c.bf16 %v827_v40, %v824_v39  ;;  %v877_v43 = vld [vmem:[#allocation8 + $0x1b8] sm:$0xff]  ;;  %v910_v40 = vld [vmem:[#allocation8 + $0x2c0] sm:$0xff] }
  0x90   :  { %v1654_v49 = vpack.c.bf16 %v826_v45, %v823_v44  ;;  %v880_v44 = vld [vmem:[#allocation8 + $0x1d0] sm:$0xff]  ;;  %v907_v39 = vld [vmem:[#allocation8 + $0x2a8] sm:$0xff] }
  0x91   :  { %v1690_v45 = vpack.c.bf16 %v880_v44, %v877_v43  ;;  %v909_v43 = vld [vmem:[#allocation8 + $0x2b8] sm:$0xff]  ;;  %v908_v44 = vld [vmem:[#allocation8 + $0x2b0] sm:$0xff] }
  0x92   :  { %1613 = vmatpush1.bf16.msra.mxu1 %v1612_v50  ;;  %v825_v50 = vld [vmem:[#allocation8 + $0x18] sm:$0xff]  ;;  %1655 = vmatprep.subr.bf16.mxu0 %v1654_v49  ;;  %v878_v49 = vld [vmem:[#allocation8 + $0x1c0] sm:$0xff] }
  0x93   :  { %1615 = vmatprep.subr.bf16.mxu1 %v1614_v51  ;;  %v829_v51 = vld [vmem:[#allocation8 + $0x38] sm:$0xff]  ;;  %v1656_v54 = vpack.c.bf16 %v825_v50, %v822_v46  ;;  %v876_v46 = vld [vmem:[#allocation8 + $0x1b0] sm:$0xff] }
  0x94   :  { %v1658_v55 = vpack.c.bf16 %v832_v52, %v829_v51  ;;  %v881_v51 = vld [vmem:[#allocation8 + $0x1d8] sm:$0xff]  ;;  %v830_v52 = vld [vmem:[#allocation8 + $0x40] sm:$0xff] }
  0x95   :  { %1657 = vmatpush1.bf16.msra.mxu0 %v1656_v54  ;;  %v1786_v54 = vpack.c.bf16 %v881_v51, %v878_v49  ;;  %v863_v49 = vld [vmem:[#allocation8 + $0x148] sm:$0xff] }
  0x96   :  { %1617 = vmatpush1.bf16.msra.mxu1 %v1616_v56  ;;  %v828_v56 = vld [vmem:[#allocation8 + $0x30] sm:$0xff]  ;;  %1659 = vmatprep.subr.bf16.mxu0 %v1658_v55 }
  0x97   :  { %1619 = vmatprep.subr.bf16.mxu1 %v1618_v57  ;;  %v831_v57 = vld [vmem:[#allocation8 + $0x48] sm:$0xff] }
  0x98   :  { %v1660_v60 = vpack.c.bf16 %v831_v57, %v828_v56  ;;  %v883_v56 = vld [vmem:[#allocation8 + $0x1e8] sm:$0xff]  ;;  %v886_v57 = vld [vmem:[#allocation8 + $0x200] sm:$0xff] }
  0x9a   :  { %1621 = vmatpush1.bf16.msra.mxu1 %v1620_v62  ;;  %v1662_v62 = vpack.c.bf16 %v838_v59, %v835_v58  ;;  %1661 = vmatpush1.bf16.msra.mxu0 %v1660_v60  ;;  %v1694_v58 = vpack.c.bf16 %v886_v57, %v883_v56  ;;  %v882_v59 = vld [vmem:[#allocation8 + $0x1e0] sm:$0xff]  ;;  %v885_v60 = vld [vmem:[#allocation8 + $0x1f8] sm:$0xff]  ;;  %v915_v56 = vld [vmem:[#allocation8 + $0x2e8] sm:$0xff] }
  0x9b   :  { %1623 = vmatprep.subr.bf16.mxu1 %v1622_v63  ;;  %v834_v63 = vld [vmem:[#allocation8 + $0x60] sm:$0xff] }
  0x9c   :  { %v1664_v2 = vpack.c.bf16 %v837_v1, %v834_v63  ;;  %1663 = vmatprep.subr.bf16.mxu0 %v1662_v62  ;;  %v1696_v62 = vpack.c.bf16 %v885_v60, %v882_v59  ;;  %v887_v63 = vld [vmem:[#allocation8 + $0x208] sm:$0xff]  ;;  %v836_v1 = vld [vmem:[#allocation8 + $0x70] sm:$0xff]  ;;  %v914_v57 = vld [vmem:[#allocation8 + $0x2e0] sm:$0xff] }
  0x9d   :  { %511 = vmatmul.mubr.f32.vlgmr.msra.gmra.mrb[4].mxu1 %v2092_v15  ;;  %v236_v15 = vld [vmem:[#allocation6 + $0x4f0] sm:$0xff]  ;;  %v917_v59 = vld [vmem:[#allocation8 + $0x2f8] sm:$0xff]  ;;  %v866_v60 = vld [vmem:[#allocation8 + $0x160] sm:$0xff] }
  0x9e   :  { %1625 = vmatpush1.bf16.msra.mxu1 %v1624_v5  ;;  %516 = vmatprep.mubr.f32.mxu1 %v2094_v17  ;;  %v1636_v17 = vpack.c.bf16 %v236_v15, %v232_v21  ;;  %v1666_v5 = vpack.c.bf16 %v844_v4, %v841_v3  ;;  %v862_v21 = vld [vmem:[#allocation8 + $0x140] sm:$0xff] }
  0x9f   :  { %1627 = vmatprep.subr.bf16.mxu1 %v1626_v6  ;;  %1665 = vmatpush1.bf16.msra.mxu0 %v1664_v2  ;;  %v840_v6 = vld [vmem:[#allocation8 + $0x90] sm:$0xff]  ;;  %v839_v2 = vld [vmem:[#allocation8 + $0x88] sm:$0xff] }
  0xa0   :  { %v1668_v8 = vpack.c.bf16 %v843_v7, %v840_v6  ;;  %1667 = vmatprep.subr.bf16.mxu0 %v1666_v5  ;;  %v1792_v4 = vpack.c.bf16 %v839_v2, %v836_v1  ;;  %v889_v5 = vld [vmem:[#allocation8 + $0x218] sm:$0xff]  ;;  %v892_v6 = vld [vmem:[#allocation8 + $0x230] sm:$0xff]  ;;  %v919_v1 = vld [vmem:[#allocation8 + $0x308] sm:$0xff] }
  0xa1   :  { %517 = vmatmul.mubr.f32.gmra.mrb[6].mxu1 %v2098_v23  ;;  %v1640_v23 = vpack.c.bf16 %v244_v27, %v240_v26  ;;  %v868_v26 = vld [vmem:[#allocation8 + $0x170] sm:$0xff]  ;;  %v1698_v7 = vpack.c.bf16 %v892_v6, %v889_v5  ;;  %v922_v2 = vld [vmem:[#allocation8 + $0x320] sm:$0xff]  ;;  %v971_v5 = vld [vmem:[#allocation8 + $0x4a8] sm:$0xff] }
  0xa2   :  { %1629 = vmatpush1.bf16.msra.mxu1 %v1628_v11  ;;  %587 = vmatprep.mubr.f32.mxu1 %v2009_v0  ;;  %v1670_v11 = vpack.c.bf16 %v850_v10, %v847_v9  ;;  %v891_v9 = vld [vmem:[#allocation8 + $0x228] sm:$0xff]  ;;  %v890_v10 = vld [vmem:[#allocation8 + $0x220] sm:$0xff] }
  0xa3   :  { %1631 = vmatprep.subr.bf16.mxu1 %v1630_v12  ;;  %1669 = vmatpush1.bf16.msra.mxu0 %v1668_v8  ;;  %v846_v12 = vld [vmem:[#allocation8 + $0xc0] sm:$0xff]  ;;  %v888_v8 = vld [vmem:[#allocation8 + $0x210] sm:$0xff] }
  0xa4   :  { %v1672_v14 = vpack.c.bf16 %v849_v13, %v846_v12  ;;  %1671 = vmatprep.subr.bf16.mxu0 %v1670_v11  ;;  %v1700_v11 = vpack.c.bf16 %v891_v9, %v888_v8  ;;  %v893_v12 = vld [vmem:[#allocation8 + $0x238] sm:$0xff]  ;;  %v842_v13 = vld [vmem:[#allocation8 + $0xa0] sm:$0xff] }
  0xa6   :  { %1633 = vmatpush1.bf16.msra.mxu1 %v1632_v19 }
  0xa7   :  { %1635 = vmatprep.subr.bf16.mxu1 %v1634_v20  ;;  %1673 = vmatpush1.bf16.msra.mxu0 %v1672_v14  ;;  %v859_v20 = vld [vmem:[#allocation8 + $0x128] sm:$0xff]  ;;  %v845_v14 = vld [vmem:[#allocation8 + $0xb8] sm:$0xff] }
  0xa8   :  { %v1678_v15 = vpack.c.bf16 %v862_v21, %v859_v20  ;;  %v897_v20 = vld [vmem:[#allocation8 + $0x258] sm:$0xff]  ;;  %v896_v21 = vld [vmem:[#allocation8 + $0x250] sm:$0xff] }
  0xaa   :  { %1637 = vmatpush1.bf16.msra.mxu1 %v1636_v17  ;;  %v1680_v17 = vpack.c.bf16 %v861_v24, %v858_v22  ;;  %v899_v22 = vld [vmem:[#allocation8 + $0x268] sm:$0xff]  ;;  %v848_v24 = vld [vmem:[#allocation8 + $0xd0] sm:$0xff] }
  0xab   :  { %1639 = vmatprep.subr.bf16.mxu1 %v1638_v25  ;;  %v865_v25 = vld [vmem:[#allocation8 + $0x158] sm:$0xff] }
  0xac   :  { %v1682_v27 = vpack.c.bf16 %v868_v26, %v865_v25  ;;  %v1798_v25 = vpack.c.bf16 %v899_v22, %v896_v21 }
  0xae   :  { %1641 = vmatpush1.bf16.msra.mxu1 %v1640_v23  ;;  %v1684_v23 = vpack.c.bf16 %v867_v29, %v864_v28  ;;  %v904_v28 = vld [vmem:[#allocation8 + $0x290] sm:$0xff] }
  0xaf   :  { %1643 = vmatprep.subr.bf16.mxu1 %v1642_v30  ;;  %v871_v30 = vld [vmem:[#allocation8 + $0x188] sm:$0xff] }
  0xb0   :  { %v1686_v32 = vpack.c.bf16 %v874_v31, %v871_v30  ;;  %v903_v30 = vld [vmem:[#allocation8 + $0x288] sm:$0xff]  ;;  %v902_v31 = vld [vmem:[#allocation8 + $0x280] sm:$0xff] }
  0xb2   :  { %1645 = vmatpush1.bf16.msra.mxu1 %v1644_v36  ;;  %v872_v36 = vld [vmem:[#allocation8 + $0x190] sm:$0xff] }
  0xb3   :  { %1647 = vmatprep.subr.bf16.mxu1 %v1646_v37  ;;  %v1688_v37 = vpack.c.bf16 %v873_v34, %v870_v33  ;;  %v1782_v41 = vpack.c.bf16 %v875_v38, %v872_v36  ;;  %v905_v33 = vld [vmem:[#allocation8 + $0x298] sm:$0xff]  ;;  %v854_v34 = vld [vmem:[#allocation8 + $0x100] sm:$0xff] }
  0xb4   :  { %v857_v36 = vld [vmem:[#allocation8 + $0x118] sm:$0xff] }
  0xb5   :  { %v1804_v38 = vpack.c.bf16 %v857_v36, %v854_v34 }
  0xb6   :  { %1649 = vmatpush1.bf16.msra.mxu1 %v1648_v47  ;;  %v879_v47 = vld [vmem:[#allocation8 + $0x1c8] sm:$0xff] }
  0xb7   :  { %1651 = vmatprep.subr.bf16.mxu1 %v1650_v53  ;;  %v1692_v50 = vpack.c.bf16 %v879_v47, %v876_v46  ;;  %v833_v53 = vld [vmem:[#allocation8 + $0x58] sm:$0xff]  ;;  %v911_v46 = vld [vmem:[#allocation8 + $0x2c8] sm:$0xff]  ;;  %v860_v47 = vld [vmem:[#allocation8 + $0x130] sm:$0xff] }
  0xb8   :  { %v1788_v55 = vpack.c.bf16 %v833_v53, %v830_v52  ;;  %v1808_v51 = vpack.c.bf16 %v863_v49, %v860_v47  ;;  %v913_v52 = vld [vmem:[#allocation8 + $0x2d8] sm:$0xff]  ;;  %v916_v53 = vld [vmem:[#allocation8 + $0x2f0] sm:$0xff] }
  0xba   :  { %1653 = vmatpush1.bf16.msra.mxu1 %v1652_v61  ;;  %v884_v61 = vld [vmem:[#allocation8 + $0x1f0] sm:$0xff] }
  0xbb   :  { %1783 = vmatprep.subr.bf16.mxu1 %v1782_v41  ;;  %v1790_v3 = vpack.c.bf16 %v887_v63, %v884_v61  ;;  %v1710_v41 = vpack.c.bf16 %v910_v40, %v907_v39  ;;  %v869_v61 = vld [vmem:[#allocation8 + $0x178] sm:$0xff] }
  0xbc   :  { %v1812_v63 = vpack.c.bf16 %v869_v61, %v866_v60 }
  0xbd   :  { %588 = vmatmul.mubr.f32.vlgmr.msra.gmra.mrb[4].mxu1 %v2085_v48  ;;  %v853_v48 = vld [vmem:[#allocation8 + $0xf8] sm:$0xff] }
  0xbe   :  { %593 = vmatprep.mubr.f32.mxu1 %v2009_v0  ;;  %v856_v0 = vld [vmem:[#allocation8 + $0x110] sm:$0xff]  ;;  %1785 = vmatpush3.bf16.msra.mxu1 %v1784_v42  ;;  %v906_v42 = vld [vmem:[#allocation8 + $0x2a0] sm:$0xff] }
  0xbf   :  { %v1674_v16 = vpack.c.bf16 %v856_v0, %v853_v48  ;;  %1787 = vmatprep.subr.bf16.mxu1 %v1786_v54  ;;  %v1794_v48 = vpack.c.bf16 %v893_v12, %v890_v10  ;;  %v1796_v0 = vpack.c.bf16 %v845_v14, %v842_v13  ;;  %v1714_v54 = vpack.c.bf16 %v916_v53, %v913_v52  ;;  %v2114_v14 = vld [vmem:[%s2279_s2] sm:$0xf] }
  0xc1   :  { %594 = vmatmul.mubr.f32.gmra.mrb[6].mxu1 %v2089_v35  ;;  %v852_v35 = vld [vmem:[#allocation8 + $0xf0] sm:$0xff]  ;;  %1675 = vmatprep.subr.bf16.mxu0 %v1674_v16  ;;  %v895_v16 = vld [vmem:[#allocation8 + $0x248] sm:$0xff] }
  0xc2   :  { %v1676_v19 = vpack.c.bf16 %v855_v18, %v852_v35  ;;  %1789 = vmatpush3.bf16.msra.mxu1 %v1788_v55  ;;  %v898_v35 = vld [vmem:[#allocation8 + $0x260] sm:$0xff]  ;;  %v912_v55 = vld [vmem:[#allocation8 + $0x2d0] sm:$0xff] }
  0xc3   :  { %1791 = vmatprep.subr.bf16.mxu1 %v1790_v3  ;;  %v1702_v18 = vpack.c.bf16 %v898_v35, %v895_v16  ;;  %v1718_v3 = vpack.c.bf16 %v922_v2, %v919_v1 }
  0xc4   :  { %1677 = vmatpush1.bf16.msra.mxu0 %v1676_v19  ;;  %v894_v19 = vld [vmem:[#allocation8 + $0x240] sm:$0xff] }
  0xc5   :  { %1679 = vmatprep.subr.bf16.mxu0 %v1678_v15  ;;  %v1704_v15 = vpack.c.bf16 %v897_v20, %v894_v19 }
  0xc6   :  { %1793 = vmatpush3.bf16.msra.mxu1 %v1792_v4  ;;  %v968_v4 = vld [vmem:[#allocation8 + $0x490] sm:$0xff] }
  0xc7   :  { %1795 = vmatprep.subr.bf16.mxu1 %v1794_v48  ;;  %v1814_v6 = vpack.c.bf16 %v971_v5, %v968_v4 }
  0xc8   :  { %1681 = vmatpush1.bf16.msra.mxu0 %v1680_v17  ;;  %v851_v17 = vld [vmem:[#allocation8 + $0xe8] sm:$0xff] }
  0xc9   :  { %1683 = vmatprep.subr.bf16.mxu0 %v1682_v27  ;;  %v1800_v26 = vpack.c.bf16 %v851_v17, %v848_v24  ;;  %v901_v27 = vld [vmem:[#allocation8 + $0x278] sm:$0xff] }
  0xca   :  { %1797 = vmatpush3.bf16.msra.mxu1 %v1796_v0  ;;  %v1706_v29 = vpack.c.bf16 %v904_v28, %v901_v27 }
  0xcb   :  { %1799 = vmatprep.subr.bf16.mxu1 %v1798_v25 }
  0xcc   :  { %1685 = vmatpush1.bf16.msra.mxu0 %v1684_v23  ;;  %v900_v23 = vld [vmem:[#allocation8 + $0x270] sm:$0xff] }
  0xcd   :  { %1687 = vmatprep.subr.bf16.mxu0 %v1686_v32  ;;  %v1708_v32 = vpack.c.bf16 %v903_v30, %v900_v23 }
  0xce   :  { %1801 = vmatpush3.bf16.msra.mxu1 %v1800_v26 }
  0xd0   :  { %1689 = vmatpush1.bf16.msra.mxu0 %v1688_v37  ;;  %v1802_v37 = vpack.c.bf16 %v905_v33, %v902_v31 }
  0xd1   :  { %1691 = vmatprep.subr.bf16.mxu0 %v1690_v45  ;;  %v1712_v45 = vpack.c.bf16 %v909_v43, %v906_v42 }
  0xd2   :  { %1803 = vmatprep.subr.bf16.mxu1 %v1802_v37 }
  0xd3   :  { %1805 = vmatpush3.bf16.msra.mxu1 %v1804_v38 }
  0xd4   :  { %1693 = vmatpush1.bf16.msra.mxu0 %v1692_v50  ;;  %v1806_v50 = vpack.c.bf16 %v911_v46, %v908_v44 }
  0xd5   :  { %1695 = vmatprep.subr.bf16.mxu0 %v1694_v58  ;;  %v1716_v58 = vpack.c.bf16 %v915_v56, %v912_v55 }
  0xd6   :  { %1807 = vmatprep.subr.bf16.mxu1 %v1806_v50 }
  0xd7   :  { %1809 = vmatpush3.bf16.msra.mxu1 %v1808_v51 }
  0xd8   :  { %1697 = vmatpush1.bf16.msra.mxu0 %v1696_v62  ;;  %v1810_v62 = vpack.c.bf16 %v917_v59, %v914_v57 }
  0xd9   :  { %1699 = vmatprep.subr.bf16.mxu0 %v1698_v7 }
  0xda   :  { %1811 = vmatprep.subr.bf16.mxu1 %v1810_v62 }
  0xdb   :  { %1813 = vmatpush3.bf16.msra.mxu1 %v1812_v63 }
  0xdc   :  { %1701 = vmatpush1.bf16.msra.mxu0 %v1700_v11  ;;  %1815 = vmatprep.subr.bf16.mxu1 %v1814_v6  ;;  %v272_v11 = vlaneseq }
  0xdd   :  { %1703 = vmatprep.subr.bf16.mxu0 %v1702_v18 }
  0xde   :  { %v2108_v12 = vshrl.u32 %v272_v11, 7 }
  0xe0   :  { %1705 = vmatpush1.bf16.msra.mxu0 %v1704_v15  ;;  %v274_v13 = vsub.s32 0, %v2108_v12  ;;  %v278_v48 = vsub.s32 1, %v2108_v12 }
  0xe1   :  { %1707 = vmatprep.subr.bf16.mxu0 %v1706_v29 }
  0xe2   :  { %v275_v0 = vrot.slane %v2114_v14, %v274_v13  ;;  %v279_v16 = vrot.slane %v2114_v14, %v278_v48 }
  0xe4   :  { %1709 = vmatpush1.bf16.msra.mxu0 %v1708_v32 }
  0xe5   :  { %1711 = vmatprep.subr.bf16.mxu0 %v1710_v41 }
  0xe8   :  { %1713 = vmatpush1.bf16.msra.mxu0 %v1712_v45 }
  0xe9   :  { %1715 = vmatprep.subr.bf16.mxu0 %v1714_v54 }
  0xec   :  { %1717 = vmatpush1.bf16.msra.mxu0 %v1716_v58 }
  0xed   :  { %1719 = vmatprep.subr.bf16.mxu0 %v1718_v3 }
 0x130   :  { %v435_v7 = vpop.f32.mrb[0].mxu1 }
 0x131   :  { %v437_v8 = vpop.f32.mrb[1].mxu1 }
 0x134   :  { %v441_v9 = vpop.f32.mrb[2].mxu1 }
 0x135   :  { %v443_v10 = vpop.f32.mrb[3].mxu1 }
 0x14e   :  { %v358_v35 = vpop.f32.mrb[0].mxu0 }
 0x14f   :  { %v359_v18 = vadd.f32 %v358_v35, %v275_v0  ;;  %v360_v19 = vpop.f32.mrb[1].mxu0 }
 0x150   :  { %v361_v20 = vadd.f32 %v360_v19, %v279_v16 }
 0x151   :  { %v2123_v21 = vadd.f32 %v435_v7, %v359_v18 }
 0x152   :  { %v2125_v15 = vadd.f32 %v437_v8, %v361_v20  ;;  %v364_v22 = vpop.f32.mrb[2].mxu0 }
 0x153   :  { %v2128_v24 = vmul.f32 0.70710677, %v2123_v21  ;;  %v365_v17 = vadd.f32 %v364_v22, %v275_v0  ;;  %v366_v25 = vpop.f32.mrb[3].mxu0 }
 0x154   :  { %v2131_v26 = vmul.f32 0.70710677, %v2125_v15  ;;  %v367_v27 = vadd.f32 %v366_v25, %v279_v16 }
 0x155   :  { %v632_v28 = vand.u32 2147483647, %v2128_v24  ;;  %v2134_v29 = vadd.f32 %v441_v9, %v365_v17  ;;  %vm616_vm0 = vcmp.lt.f32.partialorder %v2128_v24, 0.0 }
 0x156   :  { %v633_v23 = vand.u32 2147483647, %v2131_v26  ;;  %v2137_v30 = vadd.f32 %v443_v10, %v367_v27  ;;  %vm617_vm1 = vcmp.lt.f32.partialorder %v2131_v26, 0.0 }
 0x157   :  { %v640_v31 = vmul.f32 0.3275911, %v632_v28  ;;  %v2140_v32 = vmul.f32 0.70710677, %v2134_v29  ;;  %v744_v44 = vsub.f32 0.0, %v632_v28 }
 0x158   :  { %v641_v33 = vmul.f32 0.3275911, %v633_v23  ;;  %v2143_v34 = vmul.f32 0.70710677, %v2137_v30  ;;  %v745_v45 = vsub.f32 0.0, %v633_v23 }
 0x159   :  { %v648_v36 = vadd.f32 1.0, %v640_v31  ;;  %v636_v37 = vand.u32 2147483647, %v2140_v32  ;;  %v752_v49 = vmul.f32 %v744_v44, %v632_v28  ;;  %vm620_vm2 = vcmp.lt.f32.partialorder %v2140_v32, 0.0 }
 0x15a   :  { %v649_v38 = vadd.f32 1.0, %v641_v33  ;;  %v637_v40 = vand.u32 2147483647, %v2143_v34  ;;  %v753_v52 = vmul.f32 %v745_v45, %v633_v23  ;;  %vm621_vm3 = vcmp.lt.f32.partialorder %v2143_v34, 0.0 }
 0x15b   :  { %1876 = vrcp.f32 %v648_v36  ;;  %v644_v39 = vmul.f32 0.3275911, %v636_v37  ;;  %v748_v46 = vsub.f32 0.0, %v636_v37  ;;  %v760_v58 = vmul.f32 1.442695, %v752_v49 }
 0x15c   :  { %1878 = vrcp.f32 %v649_v38  ;;  %v645_v42 = vmul.f32 0.3275911, %v637_v40  ;;  %v749_v53 = vsub.f32 0.0, %v637_v40  ;;  %v762_v61 = vmul.f32 1.442695, %v753_v52 }
 0x15d   :  { %v652_v41 = vadd.f32 1.0, %v644_v39  ;;  %v756_v54 = vmul.f32 %v748_v46, %v636_v37 }
 0x15e   :  { %v653_v43 = vadd.f32 1.0, %v645_v42  ;;  %v757_v62 = vmul.f32 %v749_v53, %v637_v40 }
 0x15f   :  { %1880 = vrcp.f32 %v652_v41  ;;  %v768_v1 = vmul.f32 1.442695, %v756_v54 }
 0x160   :  { %1882 = vrcp.f32 %v653_v43  ;;  %v770_v9 = vmul.f32 1.442695, %v757_v62 }
 0x161   :  { %1884 = vpow2.f32 %v760_v58  ;;  %v918_v58 = vld [vmem:[#allocation8 + $0x300] sm:$0xff] }
 0x162   :  { %1886 = vpow2.f32 %v762_v61  ;;  %v601_v61 = vmul.f32 0.5, %v2125_v15 }
 0x163   :  { %1888 = vpow2.f32 %v768_v1  ;;  %v923_v1 = vld [vmem:[#allocation8 + $0x328] sm:$0xff] }
 0x164   :  { %1890 = vpow2.f32 %v770_v9 }
 0x165   :  { %v1877_v47 = vpop.eup %1876 }
 0x166   :  { %v1879_v50 = vpop.eup %1878  ;;  %v672_v51 = vmul.f32 1.0614054, %v1877_v47 }
 0x167   :  { %v673_v55 = vmul.f32 1.0614054, %v1879_v50 }
 0x168   :  { %v680_v56 = vadd.f32 -1.4531521, %v672_v51  ;;  %v2010_v51 = vmov 1.0  }
 0x169   :  { %v1881_v57 = vpop.eup %1880  ;;  %v681_v59 = vadd.f32 -1.4531521, %v673_v55  ;;  %v624_v52 = vsel %vm616_vm0, -1.0, %v2010_v51  ;;  %v625_v24 = vsel %vm617_vm1, -1.0, %v2010_v51 }
 0x16a   :  { %v688_v60 = vmul.f32 %v1877_v47, %v680_v56  ;;  %v676_v63 = vmul.f32 1.0614054, %v1881_v57  ;;  %v1883_v3 = vpop.eup %1882 }
 0x16b   :  { %v689_v2 = vmul.f32 %v1879_v50, %v681_v59  ;;  %v677_v7 = vmul.f32 1.0614054, %v1883_v3  ;;  %v1885_v37 = vpop.eup %1884  ;;  %v921_v59 = vld [vmem:[#allocation8 + $0x318] sm:$0xff] }
 0x16c   :  { %v696_v4 = vadd.f32 1.4214138, %v688_v60  ;;  %v684_v5 = vadd.f32 -1.4531521, %v676_v63  ;;  %v1887_v40 = vpop.eup %1886  ;;  %v920_v63 = vld [vmem:[#allocation8 + $0x310] sm:$0xff] }
 0x16d   :  { %v697_v6 = vadd.f32 1.4214138, %v689_v2  ;;  %v685_v0 = vadd.f32 -1.4531521, %v677_v7  ;;  %v1889_v43 = vpop.eup %1888  ;;  %v628_v2 = vsel %vm620_vm2, -1.0, %v2010_v51  ;;  %v977_v7 = vld [vmem:[#allocation8 + $0x4d8] sm:$0xff]  ;;  %v1816_v15 = vpack.c.bf16 %v923_v1, %v920_v63 }
 0x16e   :  { %v704_v8 = vmul.f32 %v1877_v47, %v696_v4  ;;  %v692_v10 = vmul.f32 %v1881_v57, %v684_v5  ;;  %v1891_v54 = vpop.eup %1890  ;;  %v928_v5 = vld [vmem:[#allocation8 + $0x350] sm:$0xff]  ;;  %v995_v1 = vld [vmem:[#allocation8 + $0x568] sm:$0xff] }
 0x16f   :  { %v705_v11 = vmul.f32 %v1879_v50, %v697_v6  ;;  %v693_v19 = vmul.f32 %v1883_v3, %v685_v0  ;;  %v974_v6 = vld [vmem:[#allocation8 + $0x4c0] sm:$0xff]  ;;  %v992_v63 = vld [vmem:[#allocation8 + $0x550] sm:$0xff] }
 0x170   :  { %v712_v16 = vadd.f32 -0.28449672, %v704_v8  ;;  %v700_v35 = vadd.f32 1.4214138, %v692_v10  ;;  %v600_v8 = vmul.f32 0.5, %v2123_v21  ;;  %v1720_v10 = vpack.c.bf16 %v921_v59, %v918_v58  ;;  %v926_v21 = vld [vmem:[#allocation8 + $0x340] sm:$0xff] }
 0x171   :  { %v713_v18 = vadd.f32 -0.28449672, %v705_v11  ;;  %v701_v25 = vadd.f32 1.4214138, %v693_v19  ;;  %v924_v19 = vld [vmem:[#allocation8 + $0x330] sm:$0xff]  ;;  %v943_v59 = vld [vmem:[#allocation8 + $0x3c8] sm:$0xff] }
 0x172   :  { %v720_v20 = vmul.f32 %v1877_v47, %v712_v16  ;;  %v708_v22 = vmul.f32 %v1881_v57, %v700_v35  ;;  %v629_v16 = vsel %vm621_vm3, -1.0, %v2010_v51 }
 0x173   :  { %v721_v17 = vmul.f32 %v1879_v50, %v713_v18  ;;  %v709_v31 = vmul.f32 %v1883_v3, %v701_v25  ;;  %v1818_v18 = vpack.c.bf16 %v977_v7, %v974_v6  ;;  %v929_v25 = vld [vmem:[#allocation8 + $0x358] sm:$0xff] }
 0x174   :  { %v728_v27 = vadd.f32 0.2548296, %v720_v20  ;;  %v716_v28 = vadd.f32 -0.28449672, %v708_v22  ;;  %v927_v20 = vld [vmem:[#allocation8 + $0x348] sm:$0xff] }
 0x175   :  { %v729_v23 = vadd.f32 0.2548296, %v721_v17  ;;  %v717_v39 = vadd.f32 -0.28449672, %v709_v31  ;;  %v931_v17 = vld [vmem:[#allocation8 + $0x368] sm:$0xff]  ;;  %v980_v31 = vld [vmem:[#allocation8 + $0x4f0] sm:$0xff] }
 0x176   :  { %v736_v33 = vmul.f32 %v1877_v47, %v728_v27  ;;  %v724_v36 = vmul.f32 %v1881_v57, %v716_v28  ;;  %v605_v27 = vmul.f32 0.5, %v2137_v30  ;;  %v937_v30 = vld [vmem:[#allocation8 + $0x398] sm:$0xff] }
 0x177   :  { %v737_v38 = vmul.f32 %v1879_v50, %v729_v23  ;;  %v725_v45 = vmul.f32 %v1883_v3, %v717_v39  ;;  %v934_v23 = vld [vmem:[#allocation8 + $0x380] sm:$0xff] }
 0x178   :  { %v776_v41 = vmul.f32 %v1885_v37, %v736_v33  ;;  %v732_v42 = vadd.f32 0.2548296, %v724_v36  ;;  %v983_v33 = vld [vmem:[#allocation8 + $0x508] sm:$0xff]  ;;  %v604_v36 = vmul.f32 0.5, %v2134_v29  ;;  %v930_v39 = vld [vmem:[#allocation8 + $0x360] sm:$0xff]  ;;  %v940_v29 = vld [vmem:[#allocation8 + $0x3b0] sm:$0xff] }
 0x179   :  { %v777_v44 = vmul.f32 %v1887_v40, %v737_v38  ;;  %v733_v53 = vadd.f32 0.2548296, %v725_v45  ;;  %v1724_v38 = vpack.c.bf16 %v927_v20, %v924_v19  ;;  %v933_v40 = vld [vmem:[#allocation8 + $0x378] sm:$0xff]  ;;  %v1822_v45 = vpack.c.bf16 %v983_v33, %v980_v31  ;;  %v955_v31 = vld [vmem:[#allocation8 + $0x428] sm:$0xff] }
 0x17a   :  { %v784_v46 = vsub.f32 1.0, %v776_v41  ;;  %v740_v49 = vmul.f32 %v1881_v57, %v732_v42  ;;  %v925_v57 = vld [vmem:[#allocation8 + $0x338] sm:$0xff]  ;;  %v1820_v41 = vpack.c.bf16 %v929_v25, %v926_v21  ;;  %v1730_v58 = vpack.c.bf16 %v940_v29, %v937_v30 }
 0x17b   :  { %v785_v47 = vsub.f32 1.0, %v777_v44  ;;  %v741_v26 = vmul.f32 %v1883_v3, %v733_v53  ;;  %v1722_v35 = vpack.c.bf16 %v928_v5, %v925_v57  ;;  %v282_v44 = vsub.s32 2, %v2108_v12  ;;  %v989_v53 = vld [vmem:[#allocation8 + $0x538] sm:$0xff] }
 0x17c   :  { %v792_v50 = vmul.f32 %v784_v46, %v624_v52  ;;  %v780_v55 = vmul.f32 %v1889_v43, %v740_v49  ;;  %v1726_v43 = vpack.c.bf16 %v934_v23, %v931_v17  ;;  %v932_v46 = vld [vmem:[#allocation8 + $0x370] sm:$0xff]  ;;  %v935_v49 = vld [vmem:[#allocation8 + $0x388] sm:$0xff]  ;;  %v286_v52 = vsub.s32 3, %v2108_v12  ;;  %v945_v5 = vld [vmem:[#allocation8 + $0x3d8] sm:$0xff] }
 0x17d   :  { %v793_v56 = vmul.f32 %v785_v47, %v625_v24  ;;  %v781_v32 = vmul.f32 %v1891_v54, %v741_v26  ;;  %v986_v47 = vld [vmem:[#allocation8 + $0x520] sm:$0xff]  ;;  %v1728_v54 = vpack.c.bf16 %v933_v40, %v930_v39  ;;  %v939_v24 = vld [vmem:[#allocation8 + $0x3a8] sm:$0xff] }
 0x17e   :  { %v800_v60 = vadd.f32 1.0, %v792_v50  ;;  %v788_v62 = vsub.f32 1.0, %v780_v55  ;;  %v936_v50 = vld [vmem:[#allocation8 + $0x390] sm:$0xff]  ;;  %v1824_v55 = vpack.c.bf16 %v935_v49, %v932_v46  ;;  %v1826_v26 = vpack.c.bf16 %v989_v53, %v986_v47  ;;  %v951_v17 = vld [vmem:[#allocation8 + $0x408] sm:$0xff]  ;;  %v958_v40 = vld [vmem:[#allocation8 + $0x440] sm:$0xff] }
 0x17f   :  { %v801_v4 = vadd.f32 1.0, %v793_v56  ;;  %v789_v11 = vsub.f32 1.0, %v781_v32  ;;  %v283_v56 = vrot.slane %v2114_v14, %v282_v44  ;;  %v287_v57 = vrot.slane %v2114_v14, %v286_v52  ;;  %v942_v32 = vld [vmem:[#allocation8 + $0x3c0] sm:$0xff]  ;;  %v947_v14 = vld [vmem:[#allocation8 + $0x3e8] sm:$0xff]  ;;  %v957_v52 = vld [vmem:[#allocation8 + $0x438] sm:$0xff] }
 0x180   :  { %v796_v9 = vmul.f32 %v788_v62, %v628_v2  ;;  %v808_v0 = vmul.f32 %v800_v60, %v600_v8  ;;  %v938_v60 = vld [vmem:[#allocation8 + $0x3a0] sm:$0xff]  ;;  %v1736_v20 = vpack.c.bf16 %v945_v5, %v942_v32  ;;  %v963_v32 = vld [vmem:[#allocation8 + $0x468] sm:$0xff] }
 0x181   :  { %v809_v3 = vmul.f32 %v801_v4, %v601_v61  ;;  %v797_v34 = vmul.f32 %v789_v11, %v629_v16  ;;  %v941_v61 = vld [vmem:[#allocation8 + $0x3b8] sm:$0xff]  ;;  %v946_v62 = vld [vmem:[#allocation8 + $0x3e0] sm:$0xff]  ;;  %v1732_v4 = vpack.c.bf16 %v939_v24, %v936_v50  ;;  %v944_v11 = vld [vmem:[#allocation8 + $0x3d0] sm:$0xff] }
 0x182   :  { %v804_v22 = vadd.f32 1.0, %v796_v9  ;;  %v1828_v6 = vpack.c.bf16 %v941_v61, %v938_v60  ;;  %v1734_v9 = vpack.c.bf16 %v946_v62, %v943_v59  ;;  %v998_v16 = vld [vmem:[#allocation8 + $0x580] sm:$0xff]  ;;  %v1832_v21 = vpack.c.bf16 %v947_v14, %v944_v11  ;;  %v961_v50 = vld [vmem:[#allocation8 + $0x458] sm:$0xff] }
 0x183   :  { %1078 = vmatprep.mubr.f32.mxu0 %v809_v3  ;;  %1232 = vmatprep.mubr.f32.mxu1 %v809_v3  ;;  %v805_v28 = vadd.f32 1.0, %v797_v34  ;;  %v949_v3 = vld [vmem:[#allocation8 + $0x3f8] sm:$0xff]  ;;  %v954_v49 = vld [vmem:[#allocation8 + $0x420] sm:$0xff] }
 0x184   :  { %1079 = vmatmul.mubr.f32.vlgmr.msra.gmra.mrb[4].mxu0 %v808_v0  ;;  %1233 = vmatmul.mubr.f32.vlgmr.msra.gmra.mrb[8].mxu1 %v808_v0  ;;  %v812_v42 = vmul.f32 %v804_v22, %v604_v36  ;;  %v952_v0 = vld [vmem:[#allocation8 + $0x410] sm:$0xff]  ;;  %v950_v36 = vld [vmem:[#allocation8 + $0x400] sm:$0xff]  ;;  %v1013_v61 = vld [vmem:[#allocation8 + $0x5f8] sm:$0xff]  ;;  %v1744_v62 = vpack.c.bf16 %v957_v52, %v954_v49 }
 0x185   :  { %1721 = vmatpush1.bf16.msra.mxu0 %v1720_v10  ;;  %1817 = vmatpush3.bf16.msra.mxu1 %v1816_v15  ;;  %v813_v37 = vmul.f32 %v805_v28, %v605_v27  ;;  %v1830_v10 = vpack.c.bf16 %v995_v1, %v992_v63  ;;  %v948_v22 = vld [vmem:[#allocation8 + $0x3f0] sm:$0xff]  ;;  %v1738_v23 = vpack.c.bf16 %v952_v0, %v949_v3  ;;  %v1010_v60 = vld [vmem:[#allocation8 + $0x5e0] sm:$0xff]  ;;  %v967_v3 = vld [vmem:[#allocation8 + $0x488] sm:$0xff] }
 0x186   :  { %1723 = vmatprep.subr.bf16.mxu0 %v1722_v35  ;;  %1819 = vmatprep.subr.bf16.mxu1 %v1818_v18  ;;  %v1001_v35 = vld [vmem:[#allocation8 + $0x598] sm:$0xff]  ;;  %v1740_v46 = vpack.c.bf16 %v951_v17, %v948_v22  ;;  %v960_v63 = vld [vmem:[#allocation8 + $0x450] sm:$0xff]  ;;  %v1842_v5 = vpack.c.bf16 %v1013_v61, %v1010_v60  ;;  %v982_v49 = vld [vmem:[#allocation8 + $0x500] sm:$0xff] }
 0x187   :  { %1084 = vmatprep.mubr.f32.mxu0 %v813_v37  ;;  %1237 = vmatprep.mubr.f32.mxu1 %v813_v37  ;;  %v1834_v33 = vpack.c.bf16 %v1001_v35, %v998_v16  ;;  %v953_v37 = vld [vmem:[#allocation8 + $0x418] sm:$0xff]  ;;  %v1748_v14 = vpack.c.bf16 %v963_v32, %v960_v63 }
 0x188   :  { %1085 = vmatmul.mubr.f32.gmra.mrb[6].mxu0 %v812_v42  ;;  %1238 = vmatmul.mubr.f32.gmra.mrb[10].mxu1 %v812_v42  ;;  %v1007_v42 = vld [vmem:[#allocation8 + $0x5c8] sm:$0xff]  ;;  %v1836_v29 = vpack.c.bf16 %v953_v37, %v950_v36  ;;  %v969_v22 = vld [vmem:[#allocation8 + $0x498] sm:$0xff]  ;;  %v972_v37 = vld [vmem:[#allocation8 + $0x4b0] sm:$0xff] }
 0x189   :  { %1725 = vmatpush1.bf16.msra.mxu0 %v1724_v38  ;;  %1821 = vmatpush3.bf16.msra.mxu1 %v1820_v41  ;;  %v1004_v41 = vld [vmem:[#allocation8 + $0x5b0] sm:$0xff] }
 0x18a   :  { %1727 = vmatprep.subr.bf16.mxu0 %v1726_v43  ;;  %1823 = vmatprep.subr.bf16.mxu1 %v1822_v45  ;;  %v1838_v24 = vpack.c.bf16 %v1007_v42, %v1004_v41 }
 0x18d   :  { %1729 = vmatpush1.bf16.msra.mxu0 %v1728_v54  ;;  %1825 = vmatpush3.bf16.msra.mxu1 %v1824_v55  ;;  %v1742_v54 = vpack.c.bf16 %v958_v40, %v955_v31  ;;  %v956_v55 = vld [vmem:[#allocation8 + $0x430] sm:$0xff]  ;;  %v975_v40 = vld [vmem:[#allocation8 + $0x4c8] sm:$0xff] }
 0x18e   :  { %1731 = vmatprep.subr.bf16.mxu0 %v1730_v58  ;;  %1827 = vmatprep.subr.bf16.mxu1 %v1826_v26  ;;  %v964_v26 = vld [vmem:[#allocation8 + $0x470] sm:$0xff] }
 0x190   :  { %v589_v2 = vpop.f32.mrb[4].mxu1 }
 0x191   :  { %v2165_v7 = vadd.f32 %v589_v2, %v283_v56  ;;  %v591_v8 = vpop.f32.mrb[5].mxu1  ;;  %1733 = vmatpush1.bf16.msra.mxu0 %v1732_v4  ;;  %1829 = vmatpush3.bf16.msra.mxu1 %v1828_v6  ;;  %v1746_v4 = vpack.c.bf16 %v964_v26, %v961_v50  ;;  %v962_v6 = vld [vmem:[#allocation8 + $0x460] sm:$0xff]  ;;  %v985_v50 = vld [vmem:[#allocation8 + $0x518] sm:$0xff] }
 0x192   :  { %v2167_v15 = vadd.f32 %v591_v8, %v287_v57  ;;  %1735 = vmatprep.subr.bf16.mxu0 %v1734_v9  ;;  %1831 = vmatprep.subr.bf16.mxu1 %v1830_v10  ;;  %v965_v8 = vld [vmem:[#allocation8 + $0x478] sm:$0xff]  ;;  %v970_v10 = vld [vmem:[#allocation8 + $0x4a0] sm:$0xff] }
 0x193   :  { %v2170_v18 = vmul.f32 0.70710677, %v2165_v7  ;;  %v1844_v0 = vpack.c.bf16 %v965_v8, %v962_v6  ;;  %v984_v8 = vld [vmem:[#allocation8 + $0x510] sm:$0xff] }
 0x194   :  { %v2173_v34 = vmul.f32 0.70710677, %v2167_v15  ;;  %v595_v19 = vpop.f32.mrb[6].mxu1 }
 0x195   :  { %v2176_v25 = vand.u32 2147483647, %v2170_v18  ;;  %v2178_v27 = vadd.f32 %v595_v19, %v283_v56  ;;  %v597_v28 = vpop.f32.mrb[7].mxu1  ;;  %1737 = vmatpush1.bf16.msra.mxu0 %v1736_v20  ;;  %1833 = vmatpush3.bf16.msra.mxu1 %v1832_v21  ;;  %v959_v56 = vld [vmem:[#allocation8 + $0x448] sm:$0xff]  ;;  %v1750_v19 = vpack.c.bf16 %v970_v10, %v967_v3  ;;  %v966_v20 = vld [vmem:[#allocation8 + $0x480] sm:$0xff]  ;;  %v973_v21 = vld [vmem:[#allocation8 + $0x4b8] sm:$0xff] }
 0x196   :  { %v2181_v38 = vand.u32 2147483647, %v2173_v34  ;;  %v2183_v39 = vadd.f32 %v597_v28, %v287_v57  ;;  %1739 = vmatprep.subr.bf16.mxu0 %v1738_v23  ;;  %1835 = vmatprep.subr.bf16.mxu1 %v1834_v33  ;;  %v1840_v1 = vpack.c.bf16 %v959_v56, %v956_v55  ;;  %v976_v28 = vld [vmem:[#allocation8 + $0x4d0] sm:$0xff]  ;;  %v1752_v23 = vpack.c.bf16 %v969_v22, %v966_v20  ;;  %v990_v22 = vld [vmem:[#allocation8 + $0x540] sm:$0xff] }
 0x197   :  { %v642_v43 = vmul.f32 0.3275911, %v2176_v25  ;;  %v2188_v45 = vmul.f32 0.70710677, %v2178_v27  ;;  %v746_v16 = vsub.f32 0.0, %v2176_v25  ;;  %v1754_v36 = vpack.c.bf16 %v976_v28, %v973_v21 }
 0x198   :  { %v643_v30 = vmul.f32 0.3275911, %v2181_v38  ;;  %v2191_v53 = vmul.f32 0.70710677, %v2183_v39  ;;  %v747_v17 = vsub.f32 0.0, %v2181_v38  ;;  %vm618_vm4 = vcmp.lt.f32.partialorder %v2170_v18, 0.0 }
 0x199   :  { %v650_v47 = vadd.f32 1.0, %v642_v43  ;;  %v2194_v59 = vand.u32 2147483647, %v2188_v45  ;;  %1741 = vmatpush1.bf16.msra.mxu0 %v1740_v46  ;;  %1837 = vmatpush3.bf16.msra.mxu1 %v1836_v29  ;;  %v754_v33 = vmul.f32 %v746_v16, %v2176_v25  ;;  %v979_v46 = vld [vmem:[#allocation8 + $0x4e8] sm:$0xff]  ;;  %v978_v25 = vld [vmem:[#allocation8 + $0x4e0] sm:$0xff]  ;;  %vm619_vm5 = vcmp.lt.f32.partialorder %v2173_v34, 0.0 }
 0x19a   :  { %v651_v58 = vadd.f32 1.0, %v643_v30  ;;  %v2198_v2 = vand.u32 2147483647, %v2191_v53  ;;  %1743 = vmatprep.subr.bf16.mxu0 %v1742_v54  ;;  %1839 = vmatprep.subr.bf16.mxu1 %v1838_v24  ;;  %v755_v43 = vmul.f32 %v747_v17, %v2181_v38  ;;  %v981_v54 = vld [vmem:[#allocation8 + $0x4f8] sm:$0xff]  ;;  %v1758_v56 = vpack.c.bf16 %v982_v49, %v979_v46 }
 0x19b   :  { %1892 = vrcp.f32 %v650_v47  ;;  %v646_v57 = vmul.f32 0.3275911, %v2194_v59  ;;  %v750_v30 = vsub.f32 0.0, %v2194_v59  ;;  %v1756_v47 = vpack.c.bf16 %v975_v40, %v972_v37  ;;  %v993_v17 = vld [vmem:[#allocation8 + $0x558] sm:$0xff] }
 0x19c   :  { %1894 = vrcp.f32 %v651_v58  ;;  %v647_v11 = vmul.f32 0.3275911, %v2198_v2  ;;  %v764_v24 = vmul.f32 1.442695, %v754_v33  ;;  %v751_v55 = vsub.f32 0.0, %v2198_v2  ;;  %v988_v58 = vld [vmem:[#allocation8 + $0x530] sm:$0xff] }
 0x19d   :  { %v654_v9 = vadd.f32 1.0, %v646_v57  ;;  %1745 = vmatpush1.bf16.msra.mxu0 %v1744_v62  ;;  %1841 = vmatpush3.bf16.msra.mxu1 %v1840_v1  ;;  %v766_v61 = vmul.f32 1.442695, %v755_v43  ;;  %v758_v57 = vmul.f32 %v750_v30, %v2194_v59  ;;  %v1762_v32 = vpack.c.bf16 %v988_v58, %v985_v50  ;;  %v997_v40 = vld [vmem:[#allocation8 + $0x578] sm:$0xff]  ;;  %v1006_v58 = vld [vmem:[#allocation8 + $0x5c0] sm:$0xff] }
 0x19e   :  { %v655_v35 = vadd.f32 1.0, %v647_v11  ;;  %1747 = vmatprep.subr.bf16.mxu0 %v1746_v4  ;;  %1843 = vmatprep.subr.bf16.mxu1 %v1842_v5  ;;  %v1760_v4 = vpack.c.bf16 %v981_v54, %v978_v25  ;;  %v759_v6 = vmul.f32 %v751_v55, %v2198_v2  ;;  %v996_v25 = vld [vmem:[#allocation8 + $0x570] sm:$0xff]  ;;  %v999_v54 = vld [vmem:[#allocation8 + $0x588] sm:$0xff]  ;;  %vm622_vm6 = vcmp.lt.f32.partialorder %v2188_v45, 0.0 }
 0x19f   :  { %1896 = vrcp.f32 %v654_v9  ;;  %v987_v9 = vld [vmem:[#allocation8 + $0x528] sm:$0xff]  ;;  %v772_v11 = vmul.f32 1.442695, %v758_v57  ;;  %vm623_vm7 = vcmp.lt.f32.partialorder %v2191_v53, 0.0  ;;  %v606_v53 = vmul.f32 0.5, %v2178_v27 }
 0x1a0   :  { %1898 = vrcp.f32 %v655_v35  ;;  %v1764_v2 = vpack.c.bf16 %v987_v9, %v984_v8  ;;  %v774_v28 = vmul.f32 1.442695, %v759_v6  ;;  %v1005_v6 = vld [vmem:[#allocation8 + $0x5b8] sm:$0xff] }
 0x1a1   :  { %1749 = vmatpush1.bf16.msra.mxu0 %v1748_v14  ;;  %1845 = vmatpush3.bf16.msra.mxu1 %v1844_v0  ;;  %1900 = vpow2.f32 %v764_v24  ;;  %v991_v14 = vld [vmem:[#allocation8 + $0x548] sm:$0xff]  ;;  %v994_v0 = vld [vmem:[#allocation8 + $0x560] sm:$0xff] }
 0x1a2   :  { %1751 = vmatprep.subr.bf16.mxu0 %v1750_v19  ;;  %1902 = vpow2.f32 %v766_v61 }
 0x1a3   :  { %1904 = vpow2.f32 %v772_v11  ;;  %v626_v11 = vsel %vm618_vm4, -1.0, %v2010_v51 }
 0x1a4   :  { %1906 = vpow2.f32 %v774_v28 }
 0x1a5   :  { %v2203_v31 = vpop.eup %1892  ;;  %1753 = vmatpush1.bf16.msra.mxu0 %v1752_v23  ;;  %v1766_v23 = vpack.c.bf16 %v994_v0, %v991_v14 }
 0x1a6   :  { %v2206_v41 = vpop.eup %1894  ;;  %v674_v42 = vmul.f32 1.0614054, %v2203_v31  ;;  %1755 = vmatprep.subr.bf16.mxu0 %v1754_v36 }
 0x1a7   :  { %v675_v52 = vmul.f32 1.0614054, %v2206_v41 }
 0x1a8   :  { %v682_v29 = vadd.f32 -1.4531521, %v674_v42  ;;  %v1000_v42 = vld [vmem:[#allocation8 + $0x590] sm:$0xff] }
 0x1a9   :  { %v683_v26 = vadd.f32 -1.4531521, %v675_v52  ;;  %v2213_v38 = vpop.eup %1896  ;;  %1757 = vmatpush1.bf16.msra.mxu0 %v1756_v47  ;;  %v1768_v52 = vpack.c.bf16 %v993_v17, %v990_v22  ;;  %v1770_v47 = vpack.c.bf16 %v1000_v42, %v997_v40  ;;  %v1011_v22 = vld [vmem:[#allocation8 + $0x5e8] sm:$0xff]  ;;  %v602_v42 = vmul.f32 0.5, %v2165_v7 }
 0x1aa   :  { %v690_v60 = vmul.f32 %v2203_v31, %v682_v29  ;;  %v678_v63 = vmul.f32 1.0614054, %v2213_v38  ;;  %v2219_v5 = vpop.eup %1898  ;;  %1759 = vmatprep.subr.bf16.mxu0 %v1758_v56  ;;  %v1003_v56 = vld [vmem:[#allocation8 + $0x5a8] sm:$0xff]  ;;  %v607_v7 = vmul.f32 0.5, %v2183_v39  ;;  %v1339_v39 = vld [vmem:[%s2281_s4] sm:$0x7] }
 0x1ab   :  { %v691_v62 = vmul.f32 %v2206_v41, %v683_v26  ;;  %v679_v16 = vmul.f32 1.0614054, %v2219_v5  ;;  %v1344_v27 = vrot.slane %v1339_v39, %v274_v13  ;;  %s2011_s4 = smov [#allocation9]  }
 0x1ac   :  { %v698_v1 = vadd.f32 1.4214138, %v690_v60  ;;  %v686_v10 = vadd.f32 -1.4531521, %v678_v63  ;;  %v1901_v60 = vpop.eup %1900  ;;  %s1373_s8 = sshll.u32 %s2011_s4, 4  ;;  %s1374_s8 = int_to_ptr.vmem [resolvable:$true] %s1373_s8 }
 0x1ad   :  { %v699_v3 = vadd.f32 1.4214138, %v691_v62  ;;  %1761 = vmatpush1.bf16.msra.mxu0 %v1760_v4  ;;  %v687_v21 = vadd.f32 -1.4531521, %v679_v16  ;;  %v1903_v62 = vpop.eup %1902  ;;  %s1974_s9 = scalar_lea.vmem %s1374_s8, 768  ;;  %p1979_p11 = scmp.lt.s32.totalorder %s1374_s8, %s1374_s8 }
 0x1ae   :  { %v706_v59 = vmul.f32 %v2203_v31, %v698_v1  ;;  %v694_v19 = vmul.f32 %v2213_v38, %v686_v10  ;;  %1763 = vmatprep.subr.bf16.mxu0 %v1762_v32  ;;  %v1772_v1 = vpack.c.bf16 %v999_v54, %v996_v25  ;;  %v1002_v32 = vld [vmem:[#allocation8 + $0x5a0] sm:$0xff]  ;;  %v1009_v10 = vld [vmem:[#allocation8 + $0x5d8] sm:$0xff]  ;;  %v1905_v16 = vpop.eup %1904  ;;  %p1975_p10 = scmp.ne.s32.totalorder %s1374_s8, %s1974_s9  ;;  %p1980_p12 = scmp.lt.s32.totalorder %s1974_s9, %s1974_s9 }
 0x1af   :  { %v707_v35 = vmul.f32 %v2206_v41, %v699_v3  ;;  %v695_v43 = vmul.f32 %v2219_v5, %v687_v21 }
 0x1b0   :  { %v714_v20 = vadd.f32 -0.28449672, %v706_v59  ;;  %v702_v36 = vadd.f32 1.4214138, %v694_v19  ;;  %v627_v19 = vsel %vm619_vm5, -1.0, %v2010_v51  ;;  %p1981_p13 = por %p1980_p12, %p1979_p11 }
 0x1b1   :  { %v715_v33 = vadd.f32 -0.28449672, %v707_v35  ;;  %1765 = vmatpush1.bf16.msra.mxu0 %v1764_v2  ;;  %v703_v29 = vadd.f32 1.4214138, %v695_v43  ;;  %v1008_v2 = vld [vmem:[#allocation8 + $0x5d0] sm:$0xff]  ;;  %v630_v43 = vsel %vm622_vm6, -1.0, %v2010_v51 }
 0x1b2   :  { %v722_v37 = vmul.f32 %v2203_v31, %v714_v20  ;;  %v710_v46 = vmul.f32 %v2213_v38, %v702_v36  ;;  %1767 = vmatprep.subr.bf16.mxu0 %v1766_v23  ;;  %v1776_v20 = vpack.c.bf16 %v1005_v6, %v1002_v32  ;;  %v603_v36 = vmul.f32 0.5, %v2167_v15  ;;  %p1982_p0 = pnand %p1981_p13, %p1975_p10 }
 0x1b3   :  { %v723_v30 = vmul.f32 %v2206_v41, %v715_v33  ;;  %v711_v26 = vmul.f32 %v2219_v5, %v703_v29  ;;  %v1907_v33 = vpop.eup %1906 }
 0x1b4   :  { %v730_v49 = vadd.f32 0.2548296, %v722_v37  ;;  %v718_v24 = vadd.f32 -0.28449672, %v710_v46  ;;  %v1780_v37 = vpack.c.bf16 %v1011_v22, %v1008_v2 }
 0x1b5   :  { %v731_v50 = vadd.f32 0.2548296, %v723_v30  ;;  %1769 = vmatpush1.bf16.msra.mxu0 %v1768_v52  ;;  %v719_v4 = vadd.f32 -0.28449672, %v711_v26 }
 0x1b6   :  { %v738_v55 = vmul.f32 %v2203_v31, %v730_v49  ;;  %v726_v57 = vmul.f32 %v2213_v38, %v718_v24  ;;  %1771 = vmatprep.subr.bf16.mxu0 %v1770_v47  ;;  %v1774_v31 = vpack.c.bf16 %v1006_v58, %v1003_v56 }
 0x1b7   :  { %v739_v61 = vmul.f32 %v2206_v41, %v731_v50  ;;  %v1012_v41 = vld [vmem:[#allocation8 + $0x5f0] sm:$0xff]  ;;  %v727_v59 = vmul.f32 %v2219_v5, %v719_v4 }
 0x1b8   :  { %v778_v63 = vmul.f32 %v1901_v60, %v738_v55  ;;  %v734_v9 = vadd.f32 0.2548296, %v726_v57  ;;  %v1778_v21 = vpack.c.bf16 %v1012_v41, %v1009_v10 }
 0x1b9   :  { %v779_v8 = vmul.f32 %v1903_v62, %v739_v61  ;;  %1773 = vmatpush1.bf16.msra.mxu0 %v1772_v1  ;;  %v735_v17 = vadd.f32 0.2548296, %v727_v59  ;;  %v1348_v61 = vrot.slane %v1339_v39, %v278_v48  ;;  %v1352_v62 = vrot.slane %v1339_v39, %v282_v44 }
 0x1ba   :  { %v786_v3 = vsub.f32 1.0, %v778_v63  ;;  %v742_v0 = vmul.f32 %v2213_v38, %v734_v9  ;;  %1775 = vmatprep.subr.bf16.mxu0 %v1774_v31 }
 0x1bb   :  { %v787_v14 = vsub.f32 1.0, %v779_v8  ;;  %v743_v38 = vmul.f32 %v2219_v5, %v735_v17  ;;  %v631_v5 = vsel %vm623_vm7, -1.0, %v2010_v51 }
 0x1bc   :  { %v794_v35 = vmul.f32 %v786_v3, %v626_v11  ;;  %v782_v28 = vmul.f32 %v1905_v16, %v742_v0 }
 0x1bd   :  { %v795_v18 = vmul.f32 %v787_v14, %v627_v19  ;;  %1777 = vmatpush1.bf16.msra.mxu0 %v1776_v20  ;;  %v783_v45 = vmul.f32 %v1907_v33, %v743_v38 }
 0x1be   :  { %v802_v23 = vadd.f32 1.0, %v794_v35  ;;  %v790_v40 = vsub.f32 1.0, %v782_v28  ;;  %1779 = vmatprep.subr.bf16.mxu0 %v1778_v21 }
 0x1bf   :  { %v803_v34 = vadd.f32 1.0, %v795_v18  ;;  %v791_v52 = vsub.f32 1.0, %v783_v45 }
 0x1c0   :  { %v798_v46 = vmul.f32 %v790_v40, %v630_v43  ;;  %v810_v49 = vmul.f32 %v802_v23, %v602_v42 }
 0x1c1   :  { %v811_v30 = vmul.f32 %v803_v34, %v603_v36  ;;  %1781 = vmatpush1.bf16.msra.mxu0 %v1780_v37  ;;  %v799_v15 = vmul.f32 %v791_v52, %v631_v5 }
 0x1c2   :  { %v806_v29 = vadd.f32 1.0, %v798_v46 }
 0x1c3   :  { %1155 = vmatprep.mubr.f32.mxu0 %v811_v30  ;;  %1307 = vmatprep.mubr.f32.mxu1 %v811_v30  ;;  %v807_v47 = vadd.f32 1.0, %v799_v15 }
 0x1c4   :  { %1308 = vmatmul.mubr.f32.vlgmr.msra.gmra.mrb[12].mxu1 %v810_v49  ;;  %1156 = vmatmul.mubr.f32.vlgmr.msra.gmra.mrb[4].mxu0 %v810_v49  ;;  %v814_v54 = vmul.f32 %v806_v29, %v606_v53 }
 0x1c5   :  { %v815_v25 = vmul.f32 %v807_v47, %v607_v7 }
 0x1c7   :  { %1161 = vmatprep.mubr.f32.mxu0 %v815_v25  ;;  %1312 = vmatprep.mubr.f32.mxu1 %v815_v25 }
 0x1c8   :  { %1313 = vmatmul.mubr.f32.gmra.mrb[14].mxu1 %v814_v54  ;;  %1162 = vmatmul.mubr.f32.gmra.mrb[6].mxu0 %v814_v54 }
 0x257   :  { %v1418_v50 = vpop.f32.mrb[8].mxu1 }
 0x258   :  { %v1419_v51 = vpop.f32.mrb[9].mxu1 }
 0x259   :  { %v1420_v24 = vadd.f32 %v1419_v51, %v1418_v50 }
 0x25b   :  { %v1421_v55 = vpop.f32.mrb[10].mxu1 }
 0x25c   :  { %v1422_v56 = vpop.f32.mrb[11].mxu1 }
 0x25d   :  { %v1423_v58 = vadd.f32 %v1422_v56, %v1421_v55 }
 0x297   :  { %v1456_v26 = vpop.f32.mrb[12].mxu1  ;;  %v1157_v63 = vpop.f32.mrb[4].mxu0 }
 0x298   :  { %v1457_v60 = vpop.f32.mrb[13].mxu1  ;;  %v1356_v1 = vadd.f32 %v1344_v27, %v1157_v63  ;;  %v1159_v31 = vpop.f32.mrb[5].mxu0 }
 0x299   :  { %v1458_v57 = vadd.f32 %v1457_v60, %v1456_v26  ;;  %v1357_v32 = vadd.f32 %v1348_v61, %v1159_v31 }
 0x29a   :  { %1362 = vst [vmem:[#allocation9] sm:$0xff] %v1356_v1 }
 0x29b   :  { %v1310_v4 = vadd.f32 %v1458_v57, %v1420_v24  ;;  %1363 = vst [vmem:[#allocation9 + $0x8] sm:$0xff] %v1357_v32  ;;  %v1459_v8 = vpop.f32.mrb[14].mxu1  ;;  %v1163_v9 = vpop.f32.mrb[6].mxu0 }
 0x29c   :  { %v1359_v13 = vadd.f32 %v1344_v27, %v1163_v9  ;;  %v1460_v3 = vpop.f32.mrb[15].mxu1  ;;  %v1165_v10 = vpop.f32.mrb[7].mxu0 }
 0x29d   :  { %v1358_v6 = vadd.f32 %v1352_v62, %v1310_v4  ;;  %v1461_v41 = vadd.f32 %v1460_v3, %v1459_v8  ;;  %v1360_v48 = vadd.f32 %v1348_v61, %v1165_v10 }
 0x29e   :  { %1365 = vst [vmem:[#allocation9 + $0x18] sm:$0xff] %v1359_v13 }
 0x29f   :  { %1364 = vst [vmem:[#allocation9 + $0x10] sm:$0xff] %v1358_v6  ;;  %v1315_v12 = vadd.f32 %v1461_v41, %v1423_v58  ;;  %1366 = vst [vmem:[#allocation9 + $0x20] sm:$0xff] %v1360_v48 }
 0x2a1   :  { %v1361_v44 = vadd.f32 %v1352_v62, %v1315_v12 }
 0x2a3   :  { %1367 = vst [vmem:[#allocation9 + $0x28] sm:$0xff] %v1361_v44 }
 0x2a4   :  { %1985 = shalt.err (!%p1982_p0)
}
 0x2a5   :  { %s1986_s12 = scalar_lea.hbm %s2282_s5, 768 }
 0x2a6   :  { %p1987_p1 = scmp.ne.s32.totalorder %s2282_s5, %s1986_s12  ;;  %p1990_p2 = scmp.lt.u32.totalorder %s1986_s12, %s2282_s5 }
 0x2a8   :  { %p1992_p3 = pnand %p1990_p2, %p1987_p1 }
 0x2aa   :  { %1995 = shalt.err (!%p1992_p3)
}
 0x2ab   :  { %1379 = dma.vmem_to_hbm [thread:$0]  %s1374_s8, 768, %s2282_s5, [#allocation5], %s2006_s1, %s2006_s1, %s2007_s17  }
 0x2ac   :  { %2000 = dma.done.wait [#allocation5], 768  }
 0x2ad   :  { %2001 = vsyncadd [#allocation5], 4294966528 }
 0x2ae   :  { %1383 = vsyncpa [#allocation4], 1 }
 0x2af   :  { %1384 = vsyncpa [#allocation7], 1 }
 0x2b0   :  { %1385 = vsyncpa [#allocation5], 1 }

</bundles_post_ra>
